<compile_context>
chip_gen: v7x
topology: tpu7x:2x2x1
jax: 0.10.0
libtpu: 0.0.40
codegen_flags: <defaults>
</compile_context>

<pallas_src>
import functools

import jax
import jax.numpy as jnp
from jax import lax
from jax.experimental import pallas as pl
from jax.experimental.pallas import tpu as pltpu

_BN_EPS = 1e-5  # PyTorch BatchNorm3d default


def _decoder_kernel(patches_ref, wke_ref, w_ref, maskblk_ref, wc_ref, bc_ref,
                    out_ref, *, num_objects):
    """One batch element per grid step; all objects via stacked matmuls.

    patches_ref: [1, Kp, S]      bf16  im2col (channel-major taps); row K is
                                       constant 1.0 so the fused bias/BN shift
                                       rides the MXU for free.
    wke_ref:     [1, C, NO*27]   bf16  per-object tap corrections (W.emb)*scale
    w_ref:       [C, Kp]         bf16  conv weights, BN scale folded, shift col
    maskblk_ref: [NO*27, NO*S]   bf16  block-diagonal valid-tap mask
    wc_ref:      [1, C]          bf16  classifier weights (output channel 0)
    bc_ref:      [1]             f32   classifier bias (SMEM scalar)
    out_ref:     [1, 1, NO*S]    f32   logits, lane-dense
    """
    # Shared conv term (incl. bias/BN shift): one big-K MXU matmul, f32 acc.
    base = jnp.dot(w_ref[...], patches_ref[0],
                   preferred_element_type=jnp.float32)            # [C, S]
    # Per-object corrections, all objects in one matmul (linearity:
    # conv(x + e) = conv(x) + (W.e) @ valid_mask for zero padding).
    corr = jnp.dot(wke_ref[0], maskblk_ref[...],
                   preferred_element_type=jnp.float32)            # [C, NO*S]
    # BN+ReLU epilogue on the stacked tensor (f32 VPU).
    y = jnp.maximum(jnp.concatenate([base] * num_objects, axis=1) + corr, 0.0)
    # One classifier matmul for all objects (output channel 0 is shared).
    logits = jnp.dot(wc_ref[...], y.astype(jnp.bfloat16),
                     preferred_element_type=jnp.float32)          # [1, NO*S]
    out_ref[0] = logits + bc_ref[0]


def pack_decoder3d_params(params, num_objects, spatial_shape):
    """One-time repacking of Decoder3D weights (BN folded in eval mode)."""
    D, H, W = spatial_shape
    C = params['w_conv'].shape[0]
    S = D * H * W
    K = 27 * C
    Kp = ((K + 1 + 127) // 128) * 128      # K taps + 1 shift row, 128-aligned

    inv_std = 1.0 / jnp.sqrt(params['bn_var'] + _BN_EPS)
    scale = params['bn_gamma'] * inv_std                          # [C]
    shift = (params['b_conv'] - params['bn_mean']) * scale + params['bn_beta']

    # Conv weights, channel-major taps: w_cf[cout, cin*27 + tap], BN scale
    # folded; column K holds the fused bias/BN shift (its patches row is 1.0).
    w_base = params['w_conv'].reshape(C, K) * scale[:, None]
    w_cf = jnp.concatenate(
        [w_base, shift[:, None], jnp.zeros((C, Kp - K - 1), jnp.float32)],
        axis=1).astype(jnp.bfloat16)                              # [C, Kp]

    # Scaled conv taps for the per-object correction einsum (done per call).
    wk_scaled = (params['w_conv'].reshape(C, C, 27)
                 * scale[:, None, None]).astype(jnp.float32)      # [Cout,Cin,27]

    # Valid-tap mask [27, S] (which taps hit the zero padding), made block-
    # diagonal per object so every object stacks along lanes in one matmul.
    def axis_mask(n):
        i = jnp.arange(n)[None, :] + jnp.arange(3)[:, None]       # padded idx
        return (i >= 1) & (i <= n)

    md, mh, mw = axis_mask(D), axis_mask(H), axis_mask(W)
    mask = (md[:, None, None, :, None, None]
            & mh[None, :, None, None, :, None]
            & mw[None, None, :, None, None, :]).reshape(27, S)
    mask_blk = jnp.kron(jnp.eye(num_objects, dtype=jnp.float32),
                        mask.astype(jnp.float32)).astype(jnp.bfloat16)

    # Gather indices for the one-shot im2col on the flattened padded volume.
    kd, kh, kw = jnp.meshgrid(*([jnp.arange(3)] * 3), indexing='ij')
    d, h, w = jnp.meshgrid(jnp.arange(D), jnp.arange(H), jnp.arange(W),
                           indexing='ij')
    idx = ((kd.reshape(27, 1) + d.reshape(1, S)) * ((H + 2) * (W + 2))
           + (kh.reshape(27, 1) + h.reshape(1, S)) * (W + 2)
           + (kw.reshape(27, 1) + w.reshape(1, S))).astype(jnp.int32)

    # Constant tail rows of patches: first tail row (global row K) is the 1.0
    # shift row; the rest are the K -> Kp zero padding.
    tail = jnp.zeros((Kp - K, S), jnp.bfloat16).at[0].set(1.0)

    # Classifier: the PyTorch loop keeps output channel 0 for every object.
    wc0 = params['w_cls'][0, :, 0, 0, 0].reshape(1, C).astype(jnp.bfloat16)
    bc0 = params['b_cls'][0].reshape(1).astype(jnp.float32)

    return dict(w_cf=w_cf, wk_scaled=wk_scaled, mask_blk=mask_blk,
                gather_idx=idx.reshape(-1), tail=tail, wc0=wc0, bc0=bc0)


@jax.jit
def decoder3d_pallas(query_feat, obj_emb, packed):
    """query_feat: [B, C, D, H, W], obj_emb: [B, NO, C] -> [B, NO, D, H, W]."""
    B, C, D, H, W = query_feat.shape
    NO = obj_emb.shape[1]
    S = D * H * W
    K = 27 * C
    Kp = packed['w_cf'].shape[1]

    # per-call glue #1: one-shot bf16 im2col of the zero-padded volume.
    xp = jnp.pad(query_feat.astype(jnp.bfloat16),
                 ((0, 0), (0, 0), (1, 1), (1, 1), (1, 1)))
    xp = xp.reshape(B, C, (D + 2) * (H + 2) * (W + 2))
    patches = jnp.take(xp, packed['gather_idx'], axis=2).reshape(B, K, S)
    patches = jnp.concatenate(
        [patches, jnp.broadcast_to(packed['tail'][None], (B, Kp - K, S))],
        axis=1)                                                   # [B, Kp, S]

    # per-call glue #2: per-object tap corrections (depends on obj_emb only).
    wke = jnp.einsum('uct,bnc->bunt', packed['wk_scaled'], obj_emb)
    wke = wke.reshape(B, C, NO * 27).astype(jnp.bfloat16)         # [B, C, NO*27]

    flops = 2 * B * (C * Kp * S + C * (NO * 27) * (NO * S) + C * NO * S)
    bytes_accessed = (B * Kp * S * 2 + B * C * NO * 27 * 2 + C * Kp * 2
                      + NO * 27 * NO * S * 2 + C * 2 + 4 + B * NO * S * 4)

    kernel = functools.partial(_decoder_kernel, num_objects=NO)
    out = pl.pallas_call(
        kernel,
        out_shape=jax.ShapeDtypeStruct((B, 1, NO * S), jnp.float32),
        grid=(B,),
        in_specs=[
            pl.BlockSpec((1, Kp, S), lambda b: (b, 0, 0)),
            pl.BlockSpec((1, C, NO * 27), lambda b: (b, 0, 0)),
            pl.BlockSpec((C, Kp), lambda b: (0, 0)),
            pl.BlockSpec((NO * 27, NO * S), lambda b: (0, 0)),
            pl.BlockSpec((1, C), lambda b: (0, 0)),
            pl.BlockSpec(memory_space=pltpu.MemorySpace.SMEM),
        ],
        out_specs=pl.BlockSpec((1, 1, NO * S), lambda b: (b, 0, 0)),
        compiler_params=pltpu.CompilerParams(
            dimension_semantics=("parallel",)),
        cost_estimate=pl.CostEstimate(
            flops=flops, transcendentals=0, bytes_accessed=bytes_accessed),
    )(patches, wke, packed['w_cf'], packed['mask_blk'], packed['wc0'],
      packed['bc0'])

    return out.reshape(B, NO, D, H, W)


def decoder3d_ref(query_feat, obj_emb, params):
    """Pure-JAX reference mirroring the PyTorch forward (BN in eval mode)."""
    B, C, D, H, W = query_feat.shape
    NO = obj_emb.shape[1]
    dn = ('NCDHW', 'OIDHW', 'NCDHW')
    g = params['bn_gamma'][None, :, None, None, None]
    b = params['bn_beta'][None, :, None, None, None]
    m = params['bn_mean'][None, :, None, None, None]
    v = params['bn_var'][None, :, None, None, None]
    outs = []
    for o in range(NO):
        comb = query_feat + obj_emb[:, o][:, :, None, None, None]
        z = lax.conv_general_dilated(comb, params['w_conv'], (1, 1, 1),
                                     [(1, 1)] * 3, dimension_numbers=dn)
        z = z + params['b_conv'][None, :, None, None, None]
        z = (z - m) / jnp.sqrt(v + _BN_EPS) * g + b
        z = jnp.maximum(z, 0.0)
        logit = lax.conv_general_dilated(z, params['w_cls'], (1, 1, 1),
                                         [(0, 0)] * 3, dimension_numbers=dn)
        logit = logit + params['b_cls'][None, :, None, None, None]
        outs.append(logit[:, 0:1])
    return jnp.concatenate(outs, axis=1)


if __name__ == "__main__":
    B, C, D, H, W, NO = 2, 32, 8, 8, 8, 2   # feature_dim=32, num_objects=2

    key = jax.random.PRNGKey(0)
    ks = jax.random.split(key, 10)
    query_feat = jax.random.normal(ks[0], (B, C, D, H, W), jnp.float32)
    obj_emb = jax.random.normal(ks[1], (B, NO, C), jnp.float32)
    params = dict(
        w_conv=0.05 * jax.random.normal(ks[2], (C, C, 3, 3, 3), jnp.float32),
        b_conv=0.05 * jax.random.normal(ks[3], (C,), jnp.float32),
        bn_gamma=1.0 + 0.1 * jax.random.normal(ks[4], (C,), jnp.float32),
        bn_beta=0.1 * jax.random.normal(ks[5], (C,), jnp.float32),
        bn_mean=0.1 * jax.random.normal(ks[6], (C,), jnp.float32),
        bn_var=0.5 + jnp.abs(jax.random.normal(ks[7], (C,), jnp.float32)),
        w_cls=0.1 * jax.random.normal(ks[8], (NO, C, 1, 1, 1), jnp.float32),
        b_cls=0.1 * jax.random.normal(ks[9], (NO,), jnp.float32),
    )

    # Weight repacking is hoisted: done once per weight set, reused per call.
    packed = pack_decoder3d_params(params, NO, (D, H, W))

    out = jax.block_until_ready(decoder3d_pallas(query_feat, obj_emb, packed))
    assert out.shape == (B, NO, D, H, W), out.shape

    ref = decoder3d_ref(query_feat, obj_emb, params)
    max_err = float(jnp.max(jnp.abs(out - ref)))
    # tolerance loose: conv / correction / classifier matmul operands are bf16
    assert max_err < 5e-2, f"max abs err {max_err}"

    print("KERNEL_OK")
</pallas_src>

<mosaic_0001>
module attributes {stable_mosaic.version = 11 : i64} {
  func.func @_decoder_kernel(%arg0: i32, %arg1: memref<1x896x512xbf16, #tpu.memory_space<vmem>>, %arg2: memref<1x32x54xbf16, #tpu.memory_space<vmem>>, %arg3: memref<32x896xbf16, #tpu.memory_space<vmem>>, %arg4: memref<54x1024xbf16, #tpu.memory_space<vmem>>, %arg5: memref<1x32xbf16, #tpu.memory_space<vmem>>, %arg6: memref<1xf32, #tpu.memory_space<smem>>, %arg7: memref<1x1x1024xf32, #tpu.memory_space<vmem>>) attributes {dimension_semantics = [#tpu.dimension_semantics<parallel>], iteration_bounds = array<i64: 2>, scalar_prefetch = 0 : i64, scratch_operands = 0 : i64, tpu.core_type = #tpu.core_type<tc>, window_params = [{transform_indices = @transform_0, window_bounds = array<i64: 1, 896, 512>}, {transform_indices = @transform_1, window_bounds = array<i64: 1, 32, 54>}, {pipeline_mode = #tpu.pipeline_mode<synchronous>, transform_indices = @transform_2, window_bounds = array<i64: 32, 896>}, {pipeline_mode = #tpu.pipeline_mode<synchronous>, transform_indices = @transform_3, window_bounds = array<i64: 54, 1024>}, {pipeline_mode = #tpu.pipeline_mode<synchronous>, transform_indices = @transform_4, window_bounds = array<i64: 1, 32>}, {transform_indices = @transform_5, window_bounds = array<i64: 1>}, {transform_indices = @transform_6, window_bounds = array<i64: 1, 1, 1024>}]} {
    %c0 = arith.constant 0 : index
    %c0_0 = arith.constant 0 : index
    %0 = vector.load %arg3[%c0, %c0_0] : memref<32x896xbf16, #tpu.memory_space<vmem>>, vector<32x896xbf16>
    %c0_1 = arith.constant 0 : index
    %c0_2 = arith.constant 0 : index
    %c0_3 = arith.constant 0 : index
    %1 = vector.load %arg1[%c0_1, %c0_2, %c0_3] : memref<1x896x512xbf16, #tpu.memory_space<vmem>>, vector<1x896x512xbf16>
    %2 = vector.shape_cast %1 : vector<1x896x512xbf16> to vector<896x512xbf16>
    %cst = arith.constant dense<0.000000e+00> : vector<32x512xf32>
    %3 = tpu.matmul %0, %2, %cst {dimension_numbers = #tpu.dot_dimension_numbers<[1], [0], [0], [1], [0, 0, 1, 1], [], []>} : vector<32x896xbf16>, vector<896x512xbf16>, vector<32x512xf32> -> vector<32x512xf32>
    %c0_4 = arith.constant 0 : index
    %c0_5 = arith.constant 0 : index
    %c0_6 = arith.constant 0 : index
    %4 = vector.load %arg2[%c0_4, %c0_5, %c0_6] : memref<1x32x54xbf16, #tpu.memory_space<vmem>>, vector<1x32x54xbf16>
    %5 = vector.shape_cast %4 : vector<1x32x54xbf16> to vector<32x54xbf16>
    %c0_7 = arith.constant 0 : index
    %c0_8 = arith.constant 0 : index
    %6 = vector.load %arg4[%c0_7, %c0_8] : memref<54x1024xbf16, #tpu.memory_space<vmem>>, vector<54x1024xbf16>
    %cst_9 = arith.constant dense<0.000000e+00> : vector<32x1024xf32>
    %7 = tpu.matmul %5, %6, %cst_9 {dimension_numbers = #tpu.dot_dimension_numbers<[1], [0], [0], [1], [0, 0, 1, 1], [], []>} : vector<32x54xbf16>, vector<54x1024xbf16>, vector<32x1024xf32> -> vector<32x1024xf32>
    %8 = tpu.concatenate %3, %3 in 1 : vector<32x512xf32>, vector<32x512xf32> -> vector<32x1024xf32>
    %9 = arith.addf %8, %7 : vector<32x1024xf32>
    %cst_10 = arith.constant 0.000000e+00 : f32
    %10 = vector.broadcast %cst_10 : f32 to vector<32x1024xf32>
    %11 = arith.maximumf %9, %10 : vector<32x1024xf32>
    %c0_11 = arith.constant 0 : index
    %c0_12 = arith.constant 0 : index
    %12 = vector.load %arg5[%c0_11, %c0_12] : memref<1x32xbf16, #tpu.memory_space<vmem>>, vector<1x32xbf16>
    %13 = arith.truncf %11 : vector<32x1024xf32> to vector<32x1024xbf16>
    %cst_13 = arith.constant dense<0.000000e+00> : vector<1x1024xf32>
    %14 = tpu.matmul %12, %13, %cst_13 {dimension_numbers = #tpu.dot_dimension_numbers<[1], [0], [0], [1], [0, 0, 1, 1], [], []>} : vector<1x32xbf16>, vector<32x1024xbf16>, vector<1x1024xf32> -> vector<1x1024xf32>
    %c0_14 = arith.constant 0 : index
    %15 = memref.load %arg6[%c0_14] : memref<1xf32, #tpu.memory_space<smem>>
    %16 = vector.broadcast %15 : f32 to vector<1x1024xf32>
    %17 = arith.addf %14, %16 : vector<1x1024xf32>
    %c0_15 = arith.constant 0 : index
    %c0_16 = arith.constant 0 : index
    %c0_17 = arith.constant 0 : index
    %18 = vector.load %arg7[%c0_15, %c0_16, %c0_17] : memref<1x1x1024xf32, #tpu.memory_space<vmem>>, vector<1x1x1024xf32>
    %19 = vector.shape_cast %18 : vector<1x1x1024xf32> to vector<1x1024xf32>
    %20 = vector.shape_cast %17 : vector<1x1024xf32> to vector<1x1x1024xf32>
    tpu.vector_store %arg7[%c0_15, %c0_16, %c0_17], %20 {strides = array<i32>} : memref<1x1x1024xf32, #tpu.memory_space<vmem>>, vector<1x1x1024xf32>,
    return
  }
  func.func @transform_0(%arg0: i32) -> (i32, i32, i32) {
    %c0_i32 = arith.constant 0 : i32
    %c0_i32_0 = arith.constant 0 : i32
    %c0_i32_1 = arith.constant 0 : i32
    return %arg0, %c0_i32, %c0_i32_0 : i32, i32, i32
  }
  func.func @transform_1(%arg0: i32) -> (i32, i32, i32) {
    %c0_i32 = arith.constant 0 : i32
    %c0_i32_0 = arith.constant 0 : i32
    %c0_i32_1 = arith.constant 0 : i32
    return %arg0, %c0_i32, %c0_i32_0 : i32, i32, i32
  }
  func.func @transform_2(%arg0: i32) -> (i32, i32) {
    %c0_i32 = arith.constant 0 : i32
    %c0_i32_0 = arith.constant 0 : i32
    %c0_i32_1 = arith.constant 0 : i32
    return %c0_i32, %c0_i32_0 : i32, i32
  }
  func.func @transform_3(%arg0: i32) -> (i32, i32) {
    %c0_i32 = arith.constant 0 : i32
    %c0_i32_0 = arith.constant 0 : i32
    %c0_i32_1 = arith.constant 0 : i32
    return %c0_i32, %c0_i32_0 : i32, i32
  }
  func.func @transform_4(%arg0: i32) -> (i32, i32) {
    %c0_i32 = arith.constant 0 : i32
    %c0_i32_0 = arith.constant 0 : i32
    %c0_i32_1 = arith.constant 0 : i32
    return %c0_i32, %c0_i32_0 : i32, i32
  }
  func.func @transform_5(%arg0: i32) -> i32 {
    %c0_i32 = arith.constant 0 : i32
    %c0_i32_0 = arith.constant 0 : i32
    return %c0_i32 : i32
  }
  func.func @transform_6(%arg0: i32) -> (i32, i32, i32) {
    %c0_i32 = arith.constant 0 : i32
    %c0_i32_0 = arith.constant 0 : i32
    %c0_i32_1 = arith.constant 0 : i32
    return %arg0, %c0_i32, %c0_i32_0 : i32, i32, i32
  }
}

</mosaic_0001>

<bundles_post_ra>
// kernel: decoder3d_pallas.1
= control target key start
LH: loop header
LB: loop body
LE: loop exit
PB: predicated region body
PF: predicated region fallthrough
CT: control target
= control target key end

     0   :  { %s3702_s23 = smov 0   ;;  %s4186_s0 = inlined_call_operand.vmem [shape: bf16[2,896,512], index: 0, kind: input, shape index: {}]   ;;  %s4187_s1 = inlined_call_operand.vmem [shape: bf16[2,32,54], index: 1, kind: input, shape index: {}]   ;;  %s4188_s2 = inlined_call_operand.vmem [shape: bf16[32,896], index: 2, kind: input, shape index: {}]   ;;  %s4189_s3 = inlined_call_operand.vmem [shape: bf16[54,1024], index: 3, kind: input, shape index: {}]   ;;  %s4190_s4 = inlined_call_operand.vmem [shape: bf16[1,32], index: 4, kind: input, shape index: {}]   ;;  %s4191_s5 = inlined_call_operand.<no memory space> [shape: f32[1], index: 5, kind: input, shape index: {}]   ;;  %s4192_s6 = inlined_call_operand.vmem [shape: f32[2,1,1024], index: 6, kind: output, shape index: {}]  }
   0x1   :  { %11 = sst [smem:[#allocation2]] %s4191_s5 }
   0x2 LB: > { %s2929_s24 = sadd.s32 4294967295, %s3660_s23   ;;  %p2933_p0 = scmp.ge.s32.totalorder %s3660_s23, 1  ;;  %s3660_s23 = sphi %s3702_s23, %s17_s23  }
   0x3   : > { %p223_p1 = scmp.lt.s32.totalorder %s3660_s23, 3 }
   0x5   : > { %p224_p2 = pnand %p2933_p0, %p223_p1 }
   0x6   : > { %p257_p3 = scmp.lt.s32.totalorder (!%p224_p2), %s2929_s24, 1  ;;  %v3386_v0 = vld [vmem:[%s4188_s2 + $0x4] ss:$28 sps:$4 sm:$0xff] (!%p224_p2)   ;;  %vm2317_vm0 = vcmask (!%p224_p2), 1042432   ;;  %vm2310_vm1 = vcmask (!%p224_p2), 441344   ;;  %vm2637_vm2 = vcmask (!%p224_p2), 261120  }
   0x7   : > { %227 = sbr.rel (%p224_p2) target bundleno = 734 (0x2de), region = 44  ;;  %1736 = vmatprep.mubr.bf16.mxu0 (!%p224_p2), %v3386_v0  ;;  %1948 = vmatprep.mubr.bf16.mxu1 (!%p224_p2), %v3386_v0  ;;  %s2635_s28 = sld [smem:[#allocation2]] (!%p224_p2) }
   0xe   : > { %s4194_s24 = smov (!%p257_p3, %s2929_s24), 1 }
   0xf   : > { %s3277_s5 = smul.u32 1792, %s4194_s24  ;;  %s3228_s22 = sshll.u32 %s4194_s24, 4 }
  0x10   : > { %s2937_s30 = sshll.u32 %s4194_s24, 3 }
  0x11   : > { %s3719_s29 = scalar_lea.vmem %s4186_s0, %s3277_s5  ;;  %s3910_s5 = scalar_lea.vmem %s4187_s1, %s3228_s22 }
  0x12   : > { %v3288_v1 = vld [vmem:[%s3719_s29 + $0x4] ss:$16 sps:$4 sm:$0xff]   ;;  %v3290_v2 = vld [vmem:[%s3719_s29 + $0xc] ss:$16 sps:$4 sm:$0xff]   ;;  %v3292_v3 = vld [vmem:[%s3719_s29] ss:$16 sps:$4 sm:$0xff]   ;;  %s270_s9 = scalar_lea.vmem %s4192_s6, %s2937_s30 }
  0x13   : > { %1704 = vmatprep.subr.bf16.mxu0 %v3288_v1  ;;  %v3293_v4 = vld [vmem:[%s3719_s29 + $0x8] ss:$16 sps:$4 sm:$0xff]   ;;  %1916 = vmatprep.subr.bf16.mxu1 %v3290_v2  ;;  %v3294_v5 = vld [vmem:[%s3719_s29 + $0x24] ss:$16 sps:$4 sm:$0xff]   ;;  %v3296_v6 = vld [vmem:[%s3719_s29 + $0x2c] ss:$16 sps:$4 sm:$0xff]  }
  0x14   : > { %1705 = vmatpush1.bf16.msra.mxu0 %v3292_v3  ;;  %1917 = vmatpush1.bf16.msra.mxu1 %v3293_v4  ;;  %v3298_v7 = vld [vmem:[%s3719_s29 + $0x20] ss:$16 sps:$4 sm:$0xff]   ;;  %v3299_v8 = vld [vmem:[%s3719_s29 + $0x28] ss:$16 sps:$4 sm:$0xff]   ;;  %v3300_v9 = vld [vmem:[%s3719_s29 + $0x44] ss:$16 sps:$4 sm:$0xff]  }
  0x15   : > { %1706 = vmatprep.subr.bf16.mxu0 %v3294_v5  ;;  %1918 = vmatprep.subr.bf16.mxu1 %v3296_v6  ;;  %v3302_v10 = vld [vmem:[%s3719_s29 + $0x4c] ss:$16 sps:$4 sm:$0xff]   ;;  %v3304_v11 = vld [vmem:[%s3719_s29 + $0x40] ss:$16 sps:$4 sm:$0xff]   ;;  %v3305_v12 = vld [vmem:[%s3719_s29 + $0x48] ss:$16 sps:$4 sm:$0xff]  }
  0x16   : > { %v3306_v13 = vld [vmem:[%s3719_s29 + $0x64] ss:$16 sps:$4 sm:$0xff]   ;;  %v3308_v14 = vld [vmem:[%s3719_s29 + $0x6c] ss:$16 sps:$4 sm:$0xff]   ;;  %v3310_v15 = vld [vmem:[%s3719_s29 + $0x60] ss:$16 sps:$4 sm:$0xff]  }
  0x17   : > { %v3311_v16 = vld [vmem:[%s3719_s29 + $0x68] ss:$16 sps:$4 sm:$0xff]   ;;  %v3312_v17 = vld [vmem:[%s3719_s29 + $0x84] ss:$16 sps:$4 sm:$0xff]   ;;  %v3314_v18 = vld [vmem:[%s3719_s29 + $0x8c] ss:$16 sps:$4 sm:$0xff]  }
  0x18   : > { %1707 = vmatpush1.bf16.msra.mxu0 %v3298_v7  ;;  %1919 = vmatpush1.bf16.msra.mxu1 %v3299_v8  ;;  %v3316_v19 = vld [vmem:[%s3719_s29 + $0x80] ss:$16 sps:$4 sm:$0xff]   ;;  %v3317_v20 = vld [vmem:[%s3719_s29 + $0x88] ss:$16 sps:$4 sm:$0xff]   ;;  %v3318_v21 = vld [vmem:[%s3719_s29 + $0xa4] ss:$16 sps:$4 sm:$0xff]  }
  0x19   : > { %1708 = vmatprep.subr.bf16.mxu0 %v3300_v9  ;;  %1920 = vmatprep.subr.bf16.mxu1 %v3302_v10  ;;  %v3320_v22 = vld [vmem:[%s3719_s29 + $0xac] ss:$16 sps:$4 sm:$0xff]   ;;  %v3322_v23 = vld [vmem:[%s3719_s29 + $0xa0] ss:$16 sps:$4 sm:$0xff]   ;;  %v3323_v24 = vld [vmem:[%s3719_s29 + $0xa8] ss:$16 sps:$4 sm:$0xff]  }
  0x1a   : > { %v3324_v25 = vld [vmem:[%s3719_s29 + $0xc4] ss:$16 sps:$4 sm:$0xff]   ;;  %v3326_v26 = vld [vmem:[%s3719_s29 + $0xcc] ss:$16 sps:$4 sm:$0xff]   ;;  %v3328_v27 = vld [vmem:[%s3719_s29 + $0xc0] ss:$16 sps:$4 sm:$0xff]  }
  0x1b   : > { %v3329_v28 = vld [vmem:[%s3719_s29 + $0xc8] ss:$16 sps:$4 sm:$0xff]   ;;  %v3330_v29 = vld [vmem:[%s3719_s29 + $0xe4] ss:$16 sps:$4 sm:$0xff]   ;;  %v3332_v30 = vld [vmem:[%s3719_s29 + $0xec] ss:$16 sps:$4 sm:$0xff]  }
  0x1c   : > { %1709 = vmatpush1.bf16.msra.mxu0 %v3304_v11  ;;  %1921 = vmatpush1.bf16.msra.mxu1 %v3305_v12  ;;  %v3334_v31 = vld [vmem:[%s3719_s29 + $0xe0] ss:$16 sps:$4 sm:$0xff]   ;;  %v3335_v32 = vld [vmem:[%s3719_s29 + $0xe8] ss:$16 sps:$4 sm:$0xff]   ;;  %v3336_v33 = vld [vmem:[%s3719_s29 + $0x104] ss:$16 sps:$4 sm:$0xff]  }
  0x1d   : > { %1710 = vmatprep.subr.bf16.mxu0 %v3306_v13  ;;  %1922 = vmatprep.subr.bf16.mxu1 %v3308_v14  ;;  %v3338_v34 = vld [vmem:[%s3719_s29 + $0x10c] ss:$16 sps:$4 sm:$0xff]   ;;  %v3340_v35 = vld [vmem:[%s3719_s29 + $0x100] ss:$16 sps:$4 sm:$0xff]   ;;  %v3341_v36 = vld [vmem:[%s3719_s29 + $0x108] ss:$16 sps:$4 sm:$0xff]  }
  0x1e   : > { %v3342_v37 = vld [vmem:[%s3719_s29 + $0x124] ss:$16 sps:$4 sm:$0xff]   ;;  %v3344_v38 = vld [vmem:[%s3719_s29 + $0x12c] ss:$16 sps:$4 sm:$0xff]   ;;  %v3346_v39 = vld [vmem:[%s3719_s29 + $0x120] ss:$16 sps:$4 sm:$0xff]  }
  0x1f   : > { %v3347_v40 = vld [vmem:[%s3719_s29 + $0x128] ss:$16 sps:$4 sm:$0xff]   ;;  %v3348_v41 = vld [vmem:[%s3719_s29 + $0x144] ss:$16 sps:$4 sm:$0xff]   ;;  %v3350_v42 = vld [vmem:[%s3719_s29 + $0x14c] ss:$16 sps:$4 sm:$0xff]  }
  0x20   : > { %1711 = vmatpush1.bf16.msra.mxu0 %v3310_v15  ;;  %1923 = vmatpush1.bf16.msra.mxu1 %v3311_v16  ;;  %v3352_v43 = vld [vmem:[%s3719_s29 + $0x140] ss:$16 sps:$4 sm:$0xff]   ;;  %v3353_v44 = vld [vmem:[%s3719_s29 + $0x148] ss:$16 sps:$4 sm:$0xff]   ;;  %v3354_v45 = vld [vmem:[%s3719_s29 + $0x164] ss:$16 sps:$4 sm:$0xff]  }
  0x21   : > { %1712 = vmatprep.subr.bf16.mxu0 %v3312_v17  ;;  %1924 = vmatprep.subr.bf16.mxu1 %v3314_v18  ;;  %v3356_v46 = vld [vmem:[%s3719_s29 + $0x16c] ss:$16 sps:$4 sm:$0xff]   ;;  %v3358_v47 = vld [vmem:[%s3719_s29 + $0x160] ss:$16 sps:$4 sm:$0xff]   ;;  %v3359_v48 = vld [vmem:[%s3719_s29 + $0x168] ss:$16 sps:$4 sm:$0xff]  }
  0x22   : > { %v3360_v49 = vld [vmem:[%s3719_s29 + $0x184] ss:$16 sps:$4 sm:$0xff]   ;;  %v3362_v50 = vld [vmem:[%s3719_s29 + $0x18c] ss:$16 sps:$4 sm:$0xff]   ;;  %v3364_v51 = vld [vmem:[%s3719_s29 + $0x180] ss:$16 sps:$4 sm:$0xff]  }
  0x23   : > { %v3365_v52 = vld [vmem:[%s3719_s29 + $0x188] ss:$16 sps:$4 sm:$0xff]   ;;  %v3366_v53 = vld [vmem:[%s3719_s29 + $0x1a4] ss:$16 sps:$4 sm:$0xff]   ;;  %v3368_v54 = vld [vmem:[%s3719_s29 + $0x1ac] ss:$16 sps:$4 sm:$0xff]  }
  0x24   : > { %1713 = vmatpush1.bf16.msra.mxu0 %v3316_v19  ;;  %1925 = vmatpush1.bf16.msra.mxu1 %v3317_v20  ;;  %v3370_v55 = vld [vmem:[%s3719_s29 + $0x1a0] ss:$16 sps:$4 sm:$0xff]   ;;  %v3371_v56 = vld [vmem:[%s3719_s29 + $0x1a8] ss:$16 sps:$4 sm:$0xff]   ;;  %v3372_v57 = vld [vmem:[%s3719_s29 + $0x1c4] ss:$16 sps:$4 sm:$0xff]  }
  0x25   : > { %1714 = vmatprep.subr.bf16.mxu0 %v3318_v21  ;;  %1926 = vmatprep.subr.bf16.mxu1 %v3320_v22  ;;  %v3374_v58 = vld [vmem:[%s3719_s29 + $0x1cc] ss:$16 sps:$4 sm:$0xff]   ;;  %v3376_v59 = vld [vmem:[%s3719_s29 + $0x1c0] ss:$16 sps:$4 sm:$0xff]   ;;  %v3377_v60 = vld [vmem:[%s3719_s29 + $0x1c8] ss:$16 sps:$4 sm:$0xff]  }
  0x26   : > { %v3378_v61 = vld [vmem:[%s3719_s29 + $0x1e4] ss:$16 sps:$4 sm:$0xff]   ;;  %v3380_v62 = vld [vmem:[%s3719_s29 + $0x1ec] ss:$16 sps:$4 sm:$0xff]   ;;  %v3382_v63 = vld [vmem:[%s3719_s29 + $0x1e0] ss:$16 sps:$4 sm:$0xff]  }
  0x27   : > { %v3383_v0 = vld [vmem:[%s3719_s29 + $0x1e8] ss:$16 sps:$4 sm:$0xff]   ;;  %v3389_v1 = vld [vmem:[%s3719_s29 + $0x204] ss:$16 sps:$4 sm:$0xff]   ;;  %v3392_v2 = vld [vmem:[%s3719_s29 + $0x20c] ss:$16 sps:$4 sm:$0xff]  }
  0x28   : > { %1715 = vmatpush1.bf16.msra.mxu0 %v3322_v23  ;;  %1927 = vmatpush1.bf16.msra.mxu1 %v3323_v24  ;;  %v3384_v3 = vld [vmem:[%s4188_s2] ss:$28 sps:$4 sm:$0xff]   ;;  %v3390_v5 = vld [vmem:[%s3719_s29 + $0x208] ss:$16 sps:$4 sm:$0xff]   ;;  %v3395_v6 = vld [vmem:[%s3719_s29 + $0x224] ss:$16 sps:$4 sm:$0xff]  }
  0x29   : > { %1716 = vmatprep.subr.bf16.mxu0 %v3324_v25  ;;  %1928 = vmatprep.subr.bf16.mxu1 %v3326_v26  ;;  %v3387_v4 = vld [vmem:[%s3719_s29 + $0x200] ss:$16 sps:$4 sm:$0xff]   ;;  %v3398_v7 = vld [vmem:[%s3719_s29 + $0x22c] ss:$16 sps:$4 sm:$0xff]   ;;  %v3396_v10 = vld [vmem:[%s3719_s29 + $0x228] ss:$16 sps:$4 sm:$0xff]  }
  0x2a   : > { %v3471_v8 = vld [vmem:[%s4188_s2 + $0x3c] ss:$28 sps:$4 sm:$0xff]   ;;  %v3393_v9 = vld [vmem:[%s3719_s29 + $0x220] ss:$16 sps:$4 sm:$0xff]   ;;  %v3401_v11 = vld [vmem:[%s3719_s29 + $0x244] ss:$16 sps:$4 sm:$0xff]  }
  0x2b   : > { %v3404_v12 = vld [vmem:[%s3719_s29 + $0x24c] ss:$16 sps:$4 sm:$0xff]   ;;  %v3479_v13 = vld [vmem:[%s4188_s2 + $0x38] ss:$28 sps:$4 sm:$0xff]   ;;  %v3399_v14 = vld [vmem:[%s3719_s29 + $0x240] ss:$16 sps:$4 sm:$0xff]  }
  0x2c   : > { %1717 = vmatpush1.bf16.msra.mxu0 %v3328_v27  ;;  %1929 = vmatpush1.bf16.msra.mxu1 %v3329_v28  ;;  %v3402_v15 = vld [vmem:[%s3719_s29 + $0x248] ss:$16 sps:$4 sm:$0xff]   ;;  %v3407_v16 = vld [vmem:[%s3719_s29 + $0x264] ss:$16 sps:$4 sm:$0xff]   ;;  %v3410_v17 = vld [vmem:[%s3719_s29 + $0x26c] ss:$16 sps:$4 sm:$0xff]  }
  0x2d   : > { %1718 = vmatprep.subr.bf16.mxu0 %v3330_v29  ;;  %1930 = vmatprep.subr.bf16.mxu1 %v3332_v30  ;;  %v3405_v18 = vld [vmem:[%s3719_s29 + $0x260] ss:$16 sps:$4 sm:$0xff]   ;;  %v3408_v19 = vld [vmem:[%s3719_s29 + $0x268] ss:$16 sps:$4 sm:$0xff]   ;;  %v3413_v20 = vld [vmem:[%s3719_s29 + $0x284] ss:$16 sps:$4 sm:$0xff]  }
  0x2e   : > { %v3416_v21 = vld [vmem:[%s3719_s29 + $0x28c] ss:$16 sps:$4 sm:$0xff]   ;;  %v3411_v22 = vld [vmem:[%s3719_s29 + $0x280] ss:$16 sps:$4 sm:$0xff]   ;;  %v3414_v23 = vld [vmem:[%s3719_s29 + $0x288] ss:$16 sps:$4 sm:$0xff]  }
  0x2f   : > { %v3419_v24 = vld [vmem:[%s3719_s29 + $0x2a4] ss:$16 sps:$4 sm:$0xff]   ;;  %v3422_v25 = vld [vmem:[%s3719_s29 + $0x2ac] ss:$16 sps:$4 sm:$0xff]   ;;  %v3417_v26 = vld [vmem:[%s3719_s29 + $0x2a0] ss:$16 sps:$4 sm:$0xff]  }
  0x30   : > { %1719 = vmatpush1.bf16.msra.mxu0 %v3334_v31  ;;  %1931 = vmatpush1.bf16.msra.mxu1 %v3335_v32  ;;  %v3420_v27 = vld [vmem:[%s3719_s29 + $0x2a8] ss:$16 sps:$4 sm:$0xff]   ;;  %v3425_v28 = vld [vmem:[%s3719_s29 + $0x2c4] ss:$16 sps:$4 sm:$0xff]   ;;  %v3428_v29 = vld [vmem:[%s3719_s29 + $0x2cc] ss:$16 sps:$4 sm:$0xff]  }
  0x31   : > { %1720 = vmatprep.subr.bf16.mxu0 %v3336_v33  ;;  %1932 = vmatprep.subr.bf16.mxu1 %v3338_v34  ;;  %v3488_v30 = vld [vmem:[%s4188_s2 + $0xc] ss:$28 sps:$4 sm:$0xff]   ;;  %v3423_v31 = vld [vmem:[%s3719_s29 + $0x2c0] ss:$16 sps:$4 sm:$0xff]   ;;  %v3431_v33 = vld [vmem:[%s3719_s29 + $0x2e4] ss:$16 sps:$4 sm:$0xff]  }
  0x32   : > { %v3426_v32 = vld [vmem:[%s3719_s29 + $0x2c8] ss:$16 sps:$4 sm:$0xff]   ;;  %v3434_v34 = vld [vmem:[%s3719_s29 + $0x2ec] ss:$16 sps:$4 sm:$0xff]  }
  0x34   : > { %1721 = vmatpush1.bf16.msra.mxu0 %v3340_v35  ;;  %1933 = vmatpush1.bf16.msra.mxu1 %v3341_v36  ;;  %v3429_v35 = vld [vmem:[%s3719_s29 + $0x2e0] ss:$16 sps:$4 sm:$0xff]   ;;  %v3432_v36 = vld [vmem:[%s3719_s29 + $0x2e8] ss:$16 sps:$4 sm:$0xff]  }
  0x35   : > { %1722 = vmatprep.subr.bf16.mxu0 %v3342_v37  ;;  %1934 = vmatprep.subr.bf16.mxu1 %v3344_v38  ;;  %v3437_v37 = vld [vmem:[%s3719_s29 + $0x304] ss:$16 sps:$4 sm:$0xff]   ;;  %v3440_v38 = vld [vmem:[%s3719_s29 + $0x30c] ss:$16 sps:$4 sm:$0xff]  }
  0x38   : > { %1723 = vmatpush1.bf16.msra.mxu0 %v3346_v39  ;;  %1935 = vmatpush1.bf16.msra.mxu1 %v3347_v40  ;;  %v3435_v39 = vld [vmem:[%s3719_s29 + $0x300] ss:$16 sps:$4 sm:$0xff]   ;;  %v3438_v40 = vld [vmem:[%s3719_s29 + $0x308] ss:$16 sps:$4 sm:$0xff]  }
  0x39   : > { %1724 = vmatprep.subr.bf16.mxu0 %v3348_v41  ;;  %1936 = vmatprep.subr.bf16.mxu1 %v3350_v42  ;;  %v3443_v41 = vld [vmem:[%s3719_s29 + $0x324] ss:$16 sps:$4 sm:$0xff]   ;;  %v3446_v42 = vld [vmem:[%s3719_s29 + $0x32c] ss:$16 sps:$4 sm:$0xff]  }
  0x3c   : > { %1725 = vmatpush1.bf16.msra.mxu0 %v3352_v43  ;;  %1937 = vmatpush1.bf16.msra.mxu1 %v3353_v44  ;;  %v3441_v43 = vld [vmem:[%s3719_s29 + $0x320] ss:$16 sps:$4 sm:$0xff]   ;;  %v3444_v44 = vld [vmem:[%s3719_s29 + $0x328] ss:$16 sps:$4 sm:$0xff]  }
  0x3d   : > { %1726 = vmatprep.subr.bf16.mxu0 %v3354_v45  ;;  %1938 = vmatprep.subr.bf16.mxu1 %v3356_v46  ;;  %v3449_v45 = vld [vmem:[%s3719_s29 + $0x344] ss:$16 sps:$4 sm:$0xff]   ;;  %v3452_v46 = vld [vmem:[%s3719_s29 + $0x34c] ss:$16 sps:$4 sm:$0xff]  }
  0x40   : > { %1727 = vmatpush1.bf16.msra.mxu0 %v3358_v47  ;;  %1939 = vmatpush1.bf16.msra.mxu1 %v3359_v48  ;;  %v3447_v47 = vld [vmem:[%s3719_s29 + $0x340] ss:$16 sps:$4 sm:$0xff]   ;;  %v3450_v48 = vld [vmem:[%s3719_s29 + $0x348] ss:$16 sps:$4 sm:$0xff]  }
  0x41   : > { %1728 = vmatprep.subr.bf16.mxu0 %v3360_v49  ;;  %1940 = vmatprep.subr.bf16.mxu1 %v3362_v50  ;;  %v3455_v49 = vld [vmem:[%s3719_s29 + $0x364] ss:$16 sps:$4 sm:$0xff]   ;;  %v3458_v50 = vld [vmem:[%s3719_s29 + $0x36c] ss:$16 sps:$4 sm:$0xff]  }
  0x44   : > { %1729 = vmatpush1.bf16.msra.mxu0 %v3364_v51  ;;  %1941 = vmatpush1.bf16.msra.mxu1 %v3365_v52  ;;  %v3453_v51 = vld [vmem:[%s3719_s29 + $0x360] ss:$16 sps:$4 sm:$0xff]   ;;  %v3456_v52 = vld [vmem:[%s3719_s29 + $0x368] ss:$16 sps:$4 sm:$0xff]  }
  0x45   : > { %1730 = vmatprep.subr.bf16.mxu0 %v3366_v53  ;;  %1942 = vmatprep.subr.bf16.mxu1 %v3368_v54  ;;  %v3461_v53 = vld [vmem:[%s3719_s29 + $0x384] ss:$16 sps:$4 sm:$0xff]   ;;  %v3464_v54 = vld [vmem:[%s3719_s29 + $0x38c] ss:$16 sps:$4 sm:$0xff]  }
  0x48   : > { %1731 = vmatpush1.bf16.msra.mxu0 %v3370_v55  ;;  %1943 = vmatpush1.bf16.msra.mxu1 %v3371_v56  ;;  %v3459_v55 = vld [vmem:[%s3719_s29 + $0x380] ss:$16 sps:$4 sm:$0xff]   ;;  %v3462_v56 = vld [vmem:[%s3719_s29 + $0x388] ss:$16 sps:$4 sm:$0xff]  }
  0x49   : > { %1732 = vmatprep.subr.bf16.mxu0 %v3372_v57  ;;  %1944 = vmatprep.subr.bf16.mxu1 %v3374_v58  ;;  %v3467_v57 = vld [vmem:[%s3719_s29 + $0x3a4] ss:$16 sps:$4 sm:$0xff]   ;;  %v3470_v58 = vld [vmem:[%s3719_s29 + $0x3ac] ss:$16 sps:$4 sm:$0xff]  }
  0x4c   : > { %1733 = vmatpush1.bf16.msra.mxu0 %v3376_v59  ;;  %1945 = vmatpush1.bf16.msra.mxu1 %v3377_v60  ;;  %v3465_v59 = vld [vmem:[%s3719_s29 + $0x3a0] ss:$16 sps:$4 sm:$0xff]   ;;  %v3468_v60 = vld [vmem:[%s3719_s29 + $0x3a8] ss:$16 sps:$4 sm:$0xff]  }
  0x4d   : > { %1734 = vmatprep.subr.bf16.mxu0 %v3378_v61  ;;  %1946 = vmatprep.subr.bf16.mxu1 %v3380_v62  ;;  %v3475_v61 = vld [vmem:[%s3719_s29 + $0x3c4] ss:$16 sps:$4 sm:$0xff]   ;;  %v3478_v62 = vld [vmem:[%s3719_s29 + $0x3cc] ss:$16 sps:$4 sm:$0xff]  }
  0x50   : > { %1735 = vmatpush1.bf16.msra.mxu0 %v3382_v63  ;;  %1947 = vmatpush1.bf16.msra.mxu1 %v3383_v0  ;;  %v3473_v63 = vld [vmem:[%s3719_s29 + $0x3c0] ss:$16 sps:$4 sm:$0xff]   ;;  %v3476_v0 = vld [vmem:[%s3719_s29 + $0x3c8] ss:$16 sps:$4 sm:$0xff]  }
  0x51   : > { %1757 = vmatprep.subr.bf16.mxu0 %v3389_v1  ;;  %1969 = vmatprep.subr.bf16.mxu1 %v3392_v2  ;;  %v3482_v1 = vld [vmem:[%s3719_s29 + $0x3e4] ss:$16 sps:$4 sm:$0xff]   ;;  %v3485_v2 = vld [vmem:[%s3719_s29 + $0x3ec] ss:$16 sps:$4 sm:$0xff]  }
  0x53   : > { %1737 = vmatmul.mubr.bf16.vlgmr.msra.gmra.mrb[0].mxu0 %v3384_v3  ;;  %1949 = vmatmul.mubr.bf16.vlgmr.msra.gmra.mrb[0].mxu1 %v3384_v3  ;;  %v3480_v3 = vld [vmem:[%s3719_s29 + $0x3e0] ss:$16 sps:$4 sm:$0xff]  }
  0x54   : > { %1758 = vmatpush1.bf16.msra.mxu0 %v3387_v4  ;;  %1970 = vmatpush1.bf16.msra.mxu1 %v3390_v5  ;;  %v3483_v4 = vld [vmem:[%s3719_s29 + $0x3e8] ss:$16 sps:$4 sm:$0xff]   ;;  %v3491_v5 = vld [vmem:[%s3719_s29 + $0x404] ss:$16 sps:$4 sm:$0xff]  }
  0x55   : > { %1759 = vmatprep.subr.bf16.mxu0 %v3395_v6  ;;  %1971 = vmatprep.subr.bf16.mxu1 %v3398_v7  ;;  %v3494_v6 = vld [vmem:[%s3719_s29 + $0x40c] ss:$16 sps:$4 sm:$0xff]   ;;  %v3486_v7 = vld [vmem:[%s4188_s2 + $0x8] ss:$28 sps:$4 sm:$0xff]  }
  0x56   : > { %1746 = vmatprep.mubr.bf16.mxu0 %v3471_v8  ;;  %1958 = vmatprep.mubr.bf16.mxu1 %v3471_v8  ;;  %v3489_v8 = vld [vmem:[%s3719_s29 + $0x400] ss:$16 sps:$4 sm:$0xff]  }
  0x58   : > { %1760 = vmatpush1.bf16.msra.mxu0 %v3393_v9  ;;  %1972 = vmatpush1.bf16.msra.mxu1 %v3396_v10  ;;  %v3492_v9 = vld [vmem:[%s3719_s29 + $0x408] ss:$16 sps:$4 sm:$0xff]   ;;  %v3497_v10 = vld [vmem:[%s3719_s29 + $0x424] ss:$16 sps:$4 sm:$0xff]  }
  0x59   : > { %1761 = vmatprep.subr.bf16.mxu0 %v3401_v11  ;;  %1973 = vmatprep.subr.bf16.mxu1 %v3404_v12  ;;  %v3500_v11 = vld [vmem:[%s3719_s29 + $0x42c] ss:$16 sps:$4 sm:$0xff]   ;;  %v3573_v12 = vld [vmem:[%s4188_s2 + $0x44] ss:$28 sps:$4 sm:$0xff]  }
  0x5b   : > { %1747 = vmatmul.mubr.bf16.gmra.mrb[4].mxu0 %v3479_v13  ;;  %1959 = vmatmul.mubr.bf16.gmra.mrb[4].mxu1 %v3479_v13  ;;  %v3495_v13 = vld [vmem:[%s3719_s29 + $0x420] ss:$16 sps:$4 sm:$0xff]  }
  0x5c   : > { %1762 = vmatpush1.bf16.msra.mxu0 %v3399_v14  ;;  %1974 = vmatpush1.bf16.msra.mxu1 %v3402_v15  ;;  %v3498_v14 = vld [vmem:[%s3719_s29 + $0x428] ss:$16 sps:$4 sm:$0xff]   ;;  %v3503_v15 = vld [vmem:[%s3719_s29 + $0x444] ss:$16 sps:$4 sm:$0xff]  }
  0x5d   : > { %1763 = vmatprep.subr.bf16.mxu0 %v3407_v16  ;;  %1975 = vmatprep.subr.bf16.mxu1 %v3410_v17  ;;  %v3506_v16 = vld [vmem:[%s3719_s29 + $0x44c] ss:$16 sps:$4 sm:$0xff]  }
  0x5e   : > { %1789 = vmatprep.mubr.bf16.mxu0 %v3488_v30  ;;  %2001 = vmatprep.mubr.bf16.mxu1 %v3488_v30  ;;  %v3581_v17 = vld [vmem:[%s4188_s2 + $0x40] ss:$28 sps:$4 sm:$0xff]  }
  0x5f   : > { %v3524_v30 = vld [vmem:[%s3719_s29 + $0x4ac] ss:$16 sps:$4 sm:$0xff]  }
  0x60   : > { %1764 = vmatpush1.bf16.msra.mxu0 %v3405_v18  ;;  %1976 = vmatpush1.bf16.msra.mxu1 %v3408_v19  ;;  %v3501_v18 = vld [vmem:[%s3719_s29 + $0x440] ss:$16 sps:$4 sm:$0xff]   ;;  %v3504_v19 = vld [vmem:[%s3719_s29 + $0x448] ss:$16 sps:$4 sm:$0xff]  }
  0x61   : > { %1765 = vmatprep.subr.bf16.mxu0 %v3413_v20  ;;  %1977 = vmatprep.subr.bf16.mxu1 %v3416_v21  ;;  %v3509_v20 = vld [vmem:[%s3719_s29 + $0x464] ss:$16 sps:$4 sm:$0xff]   ;;  %v3512_v21 = vld [vmem:[%s3719_s29 + $0x46c] ss:$16 sps:$4 sm:$0xff]  }
  0x64   : > { %1766 = vmatpush1.bf16.msra.mxu0 %v3411_v22  ;;  %1978 = vmatpush1.bf16.msra.mxu1 %v3414_v23  ;;  %v3590_v22 = vld [vmem:[%s4188_s2 + $0x14] ss:$28 sps:$4 sm:$0xff]  }
  0x65   : > { %1767 = vmatprep.subr.bf16.mxu0 %v3419_v24  ;;  %1979 = vmatprep.subr.bf16.mxu1 %v3422_v25  ;;  %v3507_v23 = vld [vmem:[%s3719_s29 + $0x460] ss:$16 sps:$4 sm:$0xff]   ;;  %v3510_v24 = vld [vmem:[%s3719_s29 + $0x468] ss:$16 sps:$4 sm:$0xff]   ;;  %v3515_v25 = vld [vmem:[%s3719_s29 + $0x484] ss:$16 sps:$4 sm:$0xff]  }
  0x68   : > { %1768 = vmatpush1.bf16.msra.mxu0 %v3417_v26  ;;  %1980 = vmatpush1.bf16.msra.mxu1 %v3420_v27  ;;  %v3518_v26 = vld [vmem:[%s3719_s29 + $0x48c] ss:$16 sps:$4 sm:$0xff]   ;;  %v3513_v27 = vld [vmem:[%s3719_s29 + $0x480] ss:$16 sps:$4 sm:$0xff]  }
  0x69   : > { %1769 = vmatprep.subr.bf16.mxu0 %v3425_v28  ;;  %1981 = vmatprep.subr.bf16.mxu1 %v3428_v29  ;;  %v3516_v28 = vld [vmem:[%s3719_s29 + $0x488] ss:$16 sps:$4 sm:$0xff]   ;;  %v3521_v29 = vld [vmem:[%s3719_s29 + $0x4a4] ss:$16 sps:$4 sm:$0xff]  }
  0x6c   : > { %1770 = vmatpush1.bf16.msra.mxu0 %v3423_v31  ;;  %1982 = vmatpush1.bf16.msra.mxu1 %v3426_v32  ;;  %v3519_v31 = vld [vmem:[%s3719_s29 + $0x4a0] ss:$16 sps:$4 sm:$0xff]   ;;  %v3522_v32 = vld [vmem:[%s3719_s29 + $0x4a8] ss:$16 sps:$4 sm:$0xff]  }
  0x6d   : > { %1771 = vmatprep.subr.bf16.mxu0 %v3431_v33  ;;  %1983 = vmatprep.subr.bf16.mxu1 %v3434_v34  ;;  %v3527_v33 = vld [vmem:[%s3719_s29 + $0x4c4] ss:$16 sps:$4 sm:$0xff]   ;;  %v3530_v34 = vld [vmem:[%s3719_s29 + $0x4cc] ss:$16 sps:$4 sm:$0xff]  }
  0x70   : > { %1772 = vmatpush1.bf16.msra.mxu0 %v3429_v35  ;;  %1984 = vmatpush1.bf16.msra.mxu1 %v3432_v36  ;;  %v3525_v35 = vld [vmem:[%s3719_s29 + $0x4c0] ss:$16 sps:$4 sm:$0xff]   ;;  %v3528_v36 = vld [vmem:[%s3719_s29 + $0x4c8] ss:$16 sps:$4 sm:$0xff]  }
  0x71   : > { %1773 = vmatprep.subr.bf16.mxu0 %v3437_v37  ;;  %1985 = vmatprep.subr.bf16.mxu1 %v3440_v38  ;;  %v3533_v37 = vld [vmem:[%s3719_s29 + $0x4e4] ss:$16 sps:$4 sm:$0xff]   ;;  %v3536_v38 = vld [vmem:[%s3719_s29 + $0x4ec] ss:$16 sps:$4 sm:$0xff]  }
  0x74   : > { %1774 = vmatpush1.bf16.msra.mxu0 %v3435_v39  ;;  %1986 = vmatpush1.bf16.msra.mxu1 %v3438_v40  ;;  %v3531_v39 = vld [vmem:[%s3719_s29 + $0x4e0] ss:$16 sps:$4 sm:$0xff]   ;;  %v3534_v40 = vld [vmem:[%s3719_s29 + $0x4e8] ss:$16 sps:$4 sm:$0xff]  }
  0x75   : > { %1775 = vmatprep.subr.bf16.mxu0 %v3443_v41  ;;  %1987 = vmatprep.subr.bf16.mxu1 %v3446_v42  ;;  %v3539_v41 = vld [vmem:[%s3719_s29 + $0x504] ss:$16 sps:$4 sm:$0xff]   ;;  %v3542_v42 = vld [vmem:[%s3719_s29 + $0x50c] ss:$16 sps:$4 sm:$0xff]  }
  0x78   : > { %1776 = vmatpush1.bf16.msra.mxu0 %v3441_v43  ;;  %1988 = vmatpush1.bf16.msra.mxu1 %v3444_v44  ;;  %v3537_v43 = vld [vmem:[%s3719_s29 + $0x500] ss:$16 sps:$4 sm:$0xff]   ;;  %v3540_v44 = vld [vmem:[%s3719_s29 + $0x508] ss:$16 sps:$4 sm:$0xff]  }
  0x79   : > { %1777 = vmatprep.subr.bf16.mxu0 %v3449_v45  ;;  %1989 = vmatprep.subr.bf16.mxu1 %v3452_v46  ;;  %v3545_v45 = vld [vmem:[%s3719_s29 + $0x524] ss:$16 sps:$4 sm:$0xff]   ;;  %v3548_v46 = vld [vmem:[%s3719_s29 + $0x52c] ss:$16 sps:$4 sm:$0xff]  }
  0x7c   : > { %1778 = vmatpush1.bf16.msra.mxu0 %v3447_v47  ;;  %1990 = vmatpush1.bf16.msra.mxu1 %v3450_v48  ;;  %v3543_v47 = vld [vmem:[%s3719_s29 + $0x520] ss:$16 sps:$4 sm:$0xff]   ;;  %v3546_v48 = vld [vmem:[%s3719_s29 + $0x528] ss:$16 sps:$4 sm:$0xff]  }
  0x7d   : > { %1779 = vmatprep.subr.bf16.mxu0 %v3455_v49  ;;  %1991 = vmatprep.subr.bf16.mxu1 %v3458_v50  ;;  %v3551_v49 = vld [vmem:[%s3719_s29 + $0x544] ss:$16 sps:$4 sm:$0xff]   ;;  %v3554_v50 = vld [vmem:[%s3719_s29 + $0x54c] ss:$16 sps:$4 sm:$0xff]  }
  0x80   : > { %1780 = vmatpush1.bf16.msra.mxu0 %v3453_v51  ;;  %1992 = vmatpush1.bf16.msra.mxu1 %v3456_v52  ;;  %v3549_v51 = vld [vmem:[%s3719_s29 + $0x540] ss:$16 sps:$4 sm:$0xff]   ;;  %v3552_v52 = vld [vmem:[%s3719_s29 + $0x548] ss:$16 sps:$4 sm:$0xff]  }
  0x81   : > { %1781 = vmatprep.subr.bf16.mxu0 %v3461_v53  ;;  %1993 = vmatprep.subr.bf16.mxu1 %v3464_v54  ;;  %v3557_v53 = vld [vmem:[%s3719_s29 + $0x564] ss:$16 sps:$4 sm:$0xff]   ;;  %v3560_v54 = vld [vmem:[%s3719_s29 + $0x56c] ss:$16 sps:$4 sm:$0xff]  }
  0x84   : > { %1782 = vmatpush1.bf16.msra.mxu0 %v3459_v55  ;;  %1994 = vmatpush1.bf16.msra.mxu1 %v3462_v56  ;;  %v3555_v55 = vld [vmem:[%s3719_s29 + $0x560] ss:$16 sps:$4 sm:$0xff]   ;;  %v3558_v56 = vld [vmem:[%s3719_s29 + $0x568] ss:$16 sps:$4 sm:$0xff]  }
  0x85   : > { %1783 = vmatprep.subr.bf16.mxu0 %v3467_v57  ;;  %1995 = vmatprep.subr.bf16.mxu1 %v3470_v58  ;;  %v3563_v57 = vld [vmem:[%s3719_s29 + $0x584] ss:$16 sps:$4 sm:$0xff]   ;;  %v3566_v58 = vld [vmem:[%s3719_s29 + $0x58c] ss:$16 sps:$4 sm:$0xff]  }
  0x88   : > { %1784 = vmatpush1.bf16.msra.mxu0 %v3465_v59  ;;  %1996 = vmatpush1.bf16.msra.mxu1 %v3468_v60  ;;  %v3561_v59 = vld [vmem:[%s3719_s29 + $0x580] ss:$16 sps:$4 sm:$0xff]   ;;  %v3564_v60 = vld [vmem:[%s3719_s29 + $0x588] ss:$16 sps:$4 sm:$0xff]  }
  0x89   : > { %1785 = vmatprep.subr.bf16.mxu0 %v3475_v61  ;;  %1997 = vmatprep.subr.bf16.mxu1 %v3478_v62  ;;  %v3569_v61 = vld [vmem:[%s3719_s29 + $0x5a4] ss:$16 sps:$4 sm:$0xff]   ;;  %v3572_v62 = vld [vmem:[%s3719_s29 + $0x5ac] ss:$16 sps:$4 sm:$0xff]  }
  0x8c   : > { %1786 = vmatpush1.bf16.msra.mxu0 %v3473_v63  ;;  %1998 = vmatpush1.bf16.msra.mxu1 %v3476_v0  ;;  %v3567_v63 = vld [vmem:[%s3719_s29 + $0x5a0] ss:$16 sps:$4 sm:$0xff]   ;;  %v3570_v0 = vld [vmem:[%s3719_s29 + $0x5a8] ss:$16 sps:$4 sm:$0xff]  }
  0x8d   : > { %1787 = vmatprep.subr.bf16.mxu0 %v3482_v1  ;;  %1999 = vmatprep.subr.bf16.mxu1 %v3485_v2  ;;  %v3577_v1 = vld [vmem:[%s3719_s29 + $0x5c4] ss:$16 sps:$4 sm:$0xff]   ;;  %v3580_v2 = vld [vmem:[%s3719_s29 + $0x5cc] ss:$16 sps:$4 sm:$0xff]  }
  0x90   : > { %1788 = vmatpush1.bf16.msra.mxu0 %v3480_v3  ;;  %2000 = vmatpush1.bf16.msra.mxu1 %v3483_v4  ;;  %v3575_v3 = vld [vmem:[%s3719_s29 + $0x5c0] ss:$16 sps:$4 sm:$0xff]   ;;  %v3578_v4 = vld [vmem:[%s3719_s29 + $0x5c8] ss:$16 sps:$4 sm:$0xff]  }
  0x91   : > { %1810 = vmatprep.subr.bf16.mxu0 %v3491_v5  ;;  %2022 = vmatprep.subr.bf16.mxu1 %v3494_v6  ;;  %v3584_v5 = vld [vmem:[%s3719_s29 + $0x5e4] ss:$16 sps:$4 sm:$0xff]   ;;  %v3587_v6 = vld [vmem:[%s3719_s29 + $0x5ec] ss:$16 sps:$4 sm:$0xff]  }
  0x93   : > { %1790 = vmatmul.mubr.bf16.vlgmr.msra.gmra.mrb[0].mxu0 %v3486_v7  ;;  %2002 = vmatmul.mubr.bf16.vlgmr.msra.gmra.mrb[0].mxu1 %v3486_v7  ;;  %v3582_v7 = vld [vmem:[%s3719_s29 + $0x5e0] ss:$16 sps:$4 sm:$0xff]  }
  0x94   : > { %1811 = vmatpush1.bf16.msra.mxu0 %v3489_v8  ;;  %2023 = vmatpush1.bf16.msra.mxu1 %v3492_v9  ;;  %v3585_v8 = vld [vmem:[%s3719_s29 + $0x5e8] ss:$16 sps:$4 sm:$0xff]   ;;  %v3593_v9 = vld [vmem:[%s3719_s29 + $0x604] ss:$16 sps:$4 sm:$0xff]  }
  0x95   : > { %1812 = vmatprep.subr.bf16.mxu0 %v3497_v10  ;;  %2024 = vmatprep.subr.bf16.mxu1 %v3500_v11  ;;  %v3596_v10 = vld [vmem:[%s3719_s29 + $0x60c] ss:$16 sps:$4 sm:$0xff]  }
  0x96   : > { %1799 = vmatprep.mubr.bf16.mxu0 %v3573_v12  ;;  %2011 = vmatprep.mubr.bf16.mxu1 %v3573_v12  ;;  %v3588_v11 = vld [vmem:[%s4188_s2 + $0x10] ss:$28 sps:$4 sm:$0xff]  }
  0x97   : > { %v3591_v12 = vld [vmem:[%s3719_s29 + $0x600] ss:$16 sps:$4 sm:$0xff]  }
  0x98   : > { %1813 = vmatpush1.bf16.msra.mxu0 %v3495_v13  ;;  %2025 = vmatpush1.bf16.msra.mxu1 %v3498_v14  ;;  %v3594_v13 = vld [vmem:[%s3719_s29 + $0x608] ss:$16 sps:$4 sm:$0xff]   ;;  %v3599_v14 = vld [vmem:[%s3719_s29 + $0x624] ss:$16 sps:$4 sm:$0xff]  }
  0x99   : > { %1814 = vmatprep.subr.bf16.mxu0 %v3503_v15  ;;  %2026 = vmatprep.subr.bf16.mxu1 %v3506_v16  ;;  %v3602_v15 = vld [vmem:[%s3719_s29 + $0x62c] ss:$16 sps:$4 sm:$0xff]  }
  0x9a   : > { %v3627_v16 = vld [vmem:[%s4188_s2 + $0x4c] ss:$28 sps:$4 sm:$0xff]  }
  0x9b   : > { %1800 = vmatmul.mubr.bf16.gmra.mrb[4].mxu0 %v3581_v17  ;;  %2012 = vmatmul.mubr.bf16.gmra.mrb[4].mxu1 %v3581_v17  ;;  %v3597_v17 = vld [vmem:[%s3719_s29 + $0x620] ss:$16 sps:$4 sm:$0xff]  }
  0x9c   : > { %1815 = vmatpush1.bf16.msra.mxu0 %v3501_v18  ;;  %2027 = vmatpush1.bf16.msra.mxu1 %v3504_v19  ;;  %v3600_v18 = vld [vmem:[%s3719_s29 + $0x628] ss:$16 sps:$4 sm:$0xff]   ;;  %v3605_v19 = vld [vmem:[%s3719_s29 + $0x644] ss:$16 sps:$4 sm:$0xff]  }
  0x9d   : > { %1816 = vmatprep.subr.bf16.mxu0 %v3509_v20  ;;  %2028 = vmatprep.subr.bf16.mxu1 %v3512_v21  ;;  %v3608_v20 = vld [vmem:[%s3719_s29 + $0x64c] ss:$16 sps:$4 sm:$0xff]   ;;  %v3629_v21 = vld [vmem:[%s4188_s2 + $0x48] ss:$28 sps:$4 sm:$0xff]  }
  0x9e   : > { %1842 = vmatprep.mubr.bf16.mxu0 %v3590_v22  ;;  %2054 = vmatprep.mubr.bf16.mxu1 %v3590_v22  ;;  %v3603_v22 = vld [vmem:[%s3719_s29 + $0x640] ss:$16 sps:$4 sm:$0xff]  }
  0xa0   : > { %1817 = vmatpush1.bf16.msra.mxu0 %v3507_v23  ;;  %2029 = vmatpush1.bf16.msra.mxu1 %v3510_v24  ;;  %v3606_v23 = vld [vmem:[%s3719_s29 + $0x648] ss:$16 sps:$4 sm:$0xff]   ;;  %v3611_v24 = vld [vmem:[%s3719_s29 + $0x664] ss:$16 sps:$4 sm:$0xff]  }
  0xa1   : > { %1818 = vmatprep.subr.bf16.mxu0 %v3515_v25  ;;  %2030 = vmatprep.subr.bf16.mxu1 %v3518_v26  ;;  %v3614_v25 = vld [vmem:[%s3719_s29 + $0x66c] ss:$16 sps:$4 sm:$0xff]   ;;  %v3609_v26 = vld [vmem:[%s3719_s29 + $0x660] ss:$16 sps:$4 sm:$0xff]  }
  0xa4   : > { %1819 = vmatpush1.bf16.msra.mxu0 %v3513_v27  ;;  %2031 = vmatpush1.bf16.msra.mxu1 %v3516_v28  ;;  %v3612_v27 = vld [vmem:[%s3719_s29 + $0x668] ss:$16 sps:$4 sm:$0xff]   ;;  %v3617_v28 = vld [vmem:[%s3719_s29 + $0x684] ss:$16 sps:$4 sm:$0xff]  }
  0xa5   : > { %1820 = vmatprep.subr.bf16.mxu0 %v3521_v29  ;;  %2032 = vmatprep.subr.bf16.mxu1 %v3524_v30  ;;  %v3620_v29 = vld [vmem:[%s3719_s29 + $0x68c] ss:$16 sps:$4 sm:$0xff]   ;;  %v3662_v30 = vmov 0  }
  0xa8   : > { %1821 = vmatpush1.bf16.msra.mxu0 %v3519_v31  ;;  %2033 = vmatpush1.bf16.msra.mxu1 %v3522_v32  ;;  %v3615_v31 = vld [vmem:[%s3719_s29 + $0x680] ss:$16 sps:$4 sm:$0xff]   ;;  %v3618_v32 = vld [vmem:[%s3719_s29 + $0x688] ss:$16 sps:$4 sm:$0xff]  }
  0xa9   : > { %1822 = vmatprep.subr.bf16.mxu0 %v3527_v33  ;;  %2034 = vmatprep.subr.bf16.mxu1 %v3530_v34  ;;  %v3623_v33 = vld [vmem:[%s3719_s29 + $0x6a4] ss:$16 sps:$4 sm:$0xff]   ;;  %v3626_v34 = vld [vmem:[%s3719_s29 + $0x6ac] ss:$16 sps:$4 sm:$0xff]  }
  0xac   : > { %1823 = vmatpush1.bf16.msra.mxu0 %v3525_v35  ;;  %2035 = vmatpush1.bf16.msra.mxu1 %v3528_v36  ;;  %v3621_v35 = vld [vmem:[%s3719_s29 + $0x6a0] ss:$16 sps:$4 sm:$0xff]   ;;  %v3624_v36 = vld [vmem:[%s3719_s29 + $0x6a8] ss:$16 sps:$4 sm:$0xff]  }
  0xad   : > { %1824 = vmatprep.subr.bf16.mxu0 %v3533_v37  ;;  %2036 = vmatprep.subr.bf16.mxu1 %v3536_v38  ;;  %v3632_v37 = vld [vmem:[%s3719_s29 + $0x6c4] ss:$16 sps:$4 sm:$0xff]   ;;  %v3635_v38 = vld [vmem:[%s3719_s29 + $0x6cc] ss:$16 sps:$4 sm:$0xff]  }
  0xb0   : > { %1825 = vmatpush1.bf16.msra.mxu0 %v3531_v39  ;;  %2037 = vmatpush1.bf16.msra.mxu1 %v3534_v40  ;;  %v3630_v39 = vld [vmem:[%s3719_s29 + $0x6c0] ss:$16 sps:$4 sm:$0xff]   ;;  %v3633_v40 = vld [vmem:[%s3719_s29 + $0x6c8] ss:$16 sps:$4 sm:$0xff]  }
  0xb1   : > { %1826 = vmatprep.subr.bf16.mxu0 %v3539_v41  ;;  %2038 = vmatprep.subr.bf16.mxu1 %v3542_v42  ;;  %v3638_v41 = vld [vmem:[%s3719_s29 + $0x6e4] ss:$16 sps:$4 sm:$0xff]   ;;  %v3641_v42 = vld [vmem:[%s3719_s29 + $0x6ec] ss:$16 sps:$4 sm:$0xff]  }
  0xb4   : > { %1827 = vmatpush1.bf16.msra.mxu0 %v3537_v43  ;;  %2039 = vmatpush1.bf16.msra.mxu1 %v3540_v44  ;;  %v2132_v43 = vld [vmem:[%s4189_s3] sm:$0xff] }
  0xb5   : > { %1828 = vmatprep.subr.bf16.mxu0 %v3545_v45  ;;  %2040 = vmatprep.subr.bf16.mxu1 %v3548_v46  ;;  %v2136_v44 = vld [vmem:[%s4189_s3 + $0x20] sm:$0xff]  ;;  %v2133_v45 = vld [vmem:[%s4189_s3 + $0x8] sm:$0xff] }
  0xb6   : > { %v2137_v46 = vld [vmem:[%s4189_s3 + $0x28] sm:$0xff] }
  0xb8   : > { %1829 = vmatpush1.bf16.msra.mxu0 %v3543_v47  ;;  %2041 = vmatpush1.bf16.msra.mxu1 %v3546_v48  ;;  %v3636_v47 = vld [vmem:[%s3719_s29 + $0x6e0] ss:$16 sps:$4 sm:$0xff]   ;;  %v3639_v48 = vld [vmem:[%s3719_s29 + $0x6e8] ss:$16 sps:$4 sm:$0xff]  }
  0xb9   : > { %1830 = vmatprep.subr.bf16.mxu0 %v3551_v49  ;;  %2042 = vmatprep.subr.bf16.mxu1 %v3554_v50  ;;  %v3179_v49 = vcombine.high %v2132_v43, %v2136_v44  ;;  %v3181_v50 = vcombine.high %v2133_v45, %v2137_v46 }
  0xbc   : > { %1831 = vmatpush1.bf16.msra.mxu0 %v3549_v51  ;;  %2043 = vmatpush1.bf16.msra.mxu1 %v3552_v52  ;;  %v2140_v51 = vld [vmem:[%s4189_s3 + $0x40] sm:$0xff] }
  0xbd   : > { %1832 = vmatprep.subr.bf16.mxu0 %v3557_v53  ;;  %2044 = vmatprep.subr.bf16.mxu1 %v3560_v54  ;;  %v2144_v52 = vld [vmem:[%s4189_s3 + $0x60] sm:$0xff]  ;;  %v2141_v53 = vld [vmem:[%s4189_s3 + $0x48] sm:$0xff] }
  0xbe   : > { %v2145_v54 = vld [vmem:[%s4189_s3 + $0x68] sm:$0xff] }
  0xc0   : > { %1833 = vmatpush1.bf16.msra.mxu0 %v3555_v55  ;;  %2045 = vmatpush1.bf16.msra.mxu1 %v3558_v56  ;;  %v3642_v55 = vld [vmem:[%s4188_s2 + $0x18] ss:$28 sps:$4 sm:$0xff]   ;;  %v3178_v56 = vcombine.low %v2132_v43, %v2136_v44 }
  0xc1   : > { %1834 = vmatprep.subr.bf16.mxu0 %v3563_v57  ;;  %2046 = vmatprep.subr.bf16.mxu1 %v3566_v58  ;;  %v3180_v57 = vcombine.low %v2133_v45, %v2137_v46  ;;  %v3187_v58 = vcombine.high %v2140_v51, %v2144_v52 }
  0xc4   : > { %1835 = vmatpush1.bf16.msra.mxu0 %v3561_v59  ;;  %2047 = vmatpush1.bf16.msra.mxu1 %v3564_v60  ;;  %v3189_v59 = vcombine.high %v2141_v53, %v2145_v54  ;;  %v2148_v60 = vld [vmem:[%s4189_s3 + $0x80] sm:$0xff] }
  0xc5   : > { %1836 = vmatprep.subr.bf16.mxu0 %v3569_v61  ;;  %2048 = vmatprep.subr.bf16.mxu1 %v3572_v62  ;;  %v2152_v61 = vld [vmem:[%s4189_s3 + $0xa0] sm:$0xff]  ;;  %v2149_v62 = vld [vmem:[%s4189_s3 + $0x88] sm:$0xff] }
  0xc8   : > { %1837 = vmatpush1.bf16.msra.mxu0 %v3567_v63  ;;  %2049 = vmatpush1.bf16.msra.mxu1 %v3570_v0  ;;  %v2153_v63 = vld [vmem:[%s4189_s3 + $0xa8] sm:$0xff]  ;;  %v3186_v0 = vcombine.low %v2140_v51, %v2144_v52 }
  0xc9   : > { %1838 = vmatprep.subr.bf16.mxu0 %v3577_v1  ;;  %2050 = vmatprep.subr.bf16.mxu1 %v3580_v2  ;;  %v3188_v1 = vcombine.low %v2141_v53, %v2145_v54  ;;  %v3195_v2 = vcombine.high %v2148_v60, %v2152_v61 }
  0xcc   : > { %1839 = vmatpush1.bf16.msra.mxu0 %v3575_v3  ;;  %2051 = vmatpush1.bf16.msra.mxu1 %v3578_v4  ;;  %v3197_v3 = vcombine.high %v2149_v62, %v2153_v63  ;;  %v2156_v4 = vld [vmem:[%s4189_s3 + $0xc0] sm:$0x77] }
  0xcd   : > { %1840 = vmatprep.subr.bf16.mxu0 %v3584_v5  ;;  %2052 = vmatprep.subr.bf16.mxu1 %v3587_v6  ;;  %v2157_v5 = vld [vmem:[%s4189_s3 + $0xc8] sm:$0x77] }
  0xce   : > { %v3643_v6 = vld [vmem:[%s4188_s2 + $0x50] ss:$28 sps:$4 sm:$0xff]  }
  0xd0   : > { %1841 = vmatpush1.bf16.msra.mxu0 %v3582_v7  ;;  %2053 = vmatpush1.bf16.msra.mxu1 %v3585_v8  ;;  %v3194_v7 = vcombine.low %v2148_v60, %v2152_v61  ;;  %v3196_v8 = vcombine.low %v2149_v62, %v2153_v63 }
  0xd1   : > { %1863 = vmatprep.subr.bf16.mxu0 %v3593_v9  ;;  %2075 = vmatprep.subr.bf16.mxu1 %v3596_v10  ;;  %v3203_v9 = vcombine.high %v2156_v4, %v2156_v4  ;;  %v3205_v10 = vcombine.high %v2157_v5, %v2157_v5 }
  0xd3   : > { %1843 = vmatmul.mubr.bf16.vlgmr.msra.gmra.mrb[0].mxu0 %v3588_v11  ;;  %2055 = vmatmul.mubr.bf16.vlgmr.msra.gmra.mrb[0].mxu1 %v3588_v11  ;;  %v3202_v11 = vcombine.low %v2156_v4, %v2156_v4 }
  0xd4   : > { %1864 = vmatpush1.bf16.msra.mxu0 %v3591_v12  ;;  %2076 = vmatpush1.bf16.msra.mxu1 %v3594_v13  ;;  %v3204_v12 = vcombine.low %v2157_v5, %v2157_v5  ;;  %v2134_v13 = vld [vmem:[%s4189_s3 + $0x10] sm:$0xff] }
  0xd5   : > { %1865 = vmatprep.subr.bf16.mxu0 %v3599_v14  ;;  %2077 = vmatprep.subr.bf16.mxu1 %v3602_v15  ;;  %v2138_v14 = vld [vmem:[%s4189_s3 + $0x30] sm:$0xff]  ;;  %v2135_v15 = vld [vmem:[%s4189_s3 + $0x18] sm:$0xff] }
  0xd6   : > { %1852 = vmatprep.mubr.bf16.mxu0 %v3627_v16  ;;  %2064 = vmatprep.mubr.bf16.mxu1 %v3627_v16  ;;  %v2139_v16 = vld [vmem:[%s4189_s3 + $0x38] sm:$0xff] }
  0xd8   : > { %1866 = vmatpush1.bf16.msra.mxu0 %v3597_v17  ;;  %2078 = vmatpush1.bf16.msra.mxu1 %v3600_v18  ;;  %v2319_v17 = vsel %vm2317_vm0, %v3202_v11, 0  ;;  %v2325_v18 = vsel %vm2317_vm0, %v3204_v12, 0 }
  0xd9   : > { %1867 = vmatprep.subr.bf16.mxu0 %v3605_v19  ;;  %2079 = vmatprep.subr.bf16.mxu1 %v3608_v20  ;;  %v3183_v19 = vcombine.high %v2134_v13, %v2138_v14  ;;  %v3185_v20 = vcombine.high %v2135_v15, %v2139_v16 }
  0xdb   : > { %1853 = vmatmul.mubr.bf16.gmra.mrb[4].mxu0 %v3629_v21  ;;  %2065 = vmatmul.mubr.bf16.gmra.mrb[4].mxu1 %v3629_v21  ;;  %v2142_v21 = vld [vmem:[%s4189_s3 + $0x50] sm:$0xff] }
  0xdc   : > { %1868 = vmatpush1.bf16.msra.mxu0 %v3603_v22  ;;  %2080 = vmatpush1.bf16.msra.mxu1 %v3606_v23  ;;  %v2146_v22 = vld [vmem:[%s4189_s3 + $0x70] sm:$0xff]  ;;  %v2143_v23 = vld [vmem:[%s4189_s3 + $0x58] sm:$0xff] }
  0xdd   : > { %1869 = vmatprep.subr.bf16.mxu0 %v3611_v24  ;;  %2081 = vmatprep.subr.bf16.mxu1 %v3614_v25  ;;  %v2147_v24 = vld [vmem:[%s4189_s3 + $0x78] sm:$0xff]  ;;  %v3648_v25 = vld [vmem:[%s3910_s5] sm:$0xff]  }
  0xde   : > { %1895 = vmatprep.mubr.bf16.mxu0 %v3662_v30  ;;  %2107 = vmatprep.mubr.bf16.mxu1 %v3662_v30 }
  0xe0   : > { %1870 = vmatpush1.bf16.msra.mxu0 %v3609_v26  ;;  %2082 = vmatpush1.bf16.msra.mxu1 %v3612_v27  ;;  %v3182_v26 = vcombine.low %v2134_v13, %v2138_v14  ;;  %v3184_v27 = vcombine.low %v2135_v15, %v2139_v16 }
  0xe1   : > { %1871 = vmatprep.subr.bf16.mxu0 %v3617_v28  ;;  %2083 = vmatprep.subr.bf16.mxu1 %v3620_v29  ;;  %v3191_v28 = vcombine.high %v2142_v21, %v2146_v22  ;;  %v3193_v29 = vcombine.high %v2143_v23, %v2147_v24 }
  0xe4   : > { %1872 = vmatpush1.bf16.msra.mxu0 %v3615_v31  ;;  %2084 = vmatpush1.bf16.msra.mxu1 %v3618_v32  ;;  %v2150_v31 = vld [vmem:[%s4189_s3 + $0x90] sm:$0xff] }
  0xe5   : > { %1873 = vmatprep.subr.bf16.mxu0 %v3623_v33  ;;  %2085 = vmatprep.subr.bf16.mxu1 %v3626_v34  ;;  %v2154_v32 = vld [vmem:[%s4189_s3 + $0xb0] sm:$0xff]  ;;  %v2151_v33 = vld [vmem:[%s4189_s3 + $0x98] sm:$0xff] }
  0xe6   : > { %v2155_v34 = vld [vmem:[%s4189_s3 + $0xb8] sm:$0xff] }
  0xe7   : > { %v3200_v43 = vcombine.low %v2151_v33, %v2155_v34 }
  0xe8   : > { %1874 = vmatpush1.bf16.msra.mxu0 %v3621_v35  ;;  %2086 = vmatpush1.bf16.msra.mxu1 %v3624_v36  ;;  %v3190_v35 = vcombine.low %v2142_v21, %v2146_v22  ;;  %v3192_v36 = vcombine.low %v2143_v23, %v2147_v24 }
  0xe9   : > { %1875 = vmatprep.subr.bf16.mxu0 %v3632_v37  ;;  %2087 = vmatprep.subr.bf16.mxu1 %v3635_v38  ;;  %v3199_v37 = vcombine.high %v2150_v31, %v2154_v32  ;;  %v3201_v38 = vcombine.high %v2151_v33, %v2155_v34 }
  0xec   : > { %1876 = vmatpush1.bf16.msra.mxu0 %v3630_v39  ;;  %2088 = vmatpush1.bf16.msra.mxu1 %v3633_v40  ;;  %v2158_v39 = vld [vmem:[%s4189_s3 + $0xd0] sm:$0x77]  ;;  %v2159_v40 = vld [vmem:[%s4189_s3 + $0xd8] sm:$0x77] }
  0xed   : > { %1877 = vmatprep.subr.bf16.mxu0 %v3638_v41  ;;  %2089 = vmatprep.subr.bf16.mxu1 %v3641_v42  ;;  %v3649_v41 = vld [vmem:[%s3910_s5 + $0x8] sm:$0xff]   ;;  %v3198_v42 = vcombine.low %v2150_v31, %v2154_v32  ;;  %v3207_v44 = vcombine.high %v2158_v39, %v2158_v39  ;;  %v3209_v45 = vcombine.high %v2159_v40, %v2159_v40 }
  0xee   : > { %v3206_v46 = vcombine.low %v2158_v39, %v2158_v39 }
  0xf0   : > { %1878 = vmatpush1.bf16.msra.mxu0 %v3636_v47  ;;  %2090 = vmatpush1.bf16.msra.mxu1 %v3639_v48  ;;  %v3208_v47 = vcombine.low %v2159_v40, %v2159_v40  ;;  %v2331_v48 = vsel %vm2317_vm0, %v3206_v46, 0 }
  0xf1   : > { %2342 = vmatprep.subr.bf16.mxu0 %v3179_v49  ;;  %2395 = vmatprep.subr.bf16.mxu1 %v3181_v50 }
  0xf2   : > { %v2337_v49 = vsel %vm2317_vm0, %v3208_v47, 0 }
  0xf3   : > { %1896 = vmatmul.mubr.bf16.vlgmr.msra.gmra.mrb[0].mxu0 %v3642_v55  ;;  %2108 = vmatmul.mubr.bf16.vlgmr.msra.gmra.mrb[0].mxu1 %v3642_v55 }
  0xf4   : > { %2343 = vmatpush1.bf16.msra.mxu0 %v3178_v56  ;;  %2396 = vmatpush1.bf16.msra.mxu1 %v3180_v57 }
  0xf5   : > { %2344 = vmatprep.subr.bf16.mxu0 %v3187_v58  ;;  %2397 = vmatprep.subr.bf16.mxu1 %v3189_v59 }
  0xf6   : > { %1905 = vmatprep.mubr.bf16.mxu0 %v3662_v30  ;;  %2117 = vmatprep.mubr.bf16.mxu1 %v3662_v30 }
  0xf8   : > { %2345 = vmatpush1.bf16.msra.mxu0 %v3186_v0  ;;  %2398 = vmatpush1.bf16.msra.mxu1 %v3188_v1 }
  0xf9   : > { %2346 = vmatprep.subr.bf16.mxu0 %v3195_v2  ;;  %2399 = vmatprep.subr.bf16.mxu1 %v3197_v3 }
  0xfb   : > { %1906 = vmatmul.mubr.bf16.gmra.mrb[4].mxu0 %v3643_v6  ;;  %2118 = vmatmul.mubr.bf16.gmra.mrb[4].mxu1 %v3643_v6 }
  0xfc   : > { %2347 = vmatpush1.bf16.msra.mxu0 %v3194_v7  ;;  %2400 = vmatpush1.bf16.msra.mxu1 %v3196_v8 }
  0xfd   : > { %3210 = vmatprep.subr.msk.bf16.mxu0 %vm2317_vm0, %v3203_v9  ;;  %3213 = vmatprep.subr.msk.bf16.mxu1 %vm2317_vm0, %v3205_v10 }
  0xfe   : > { %2374 = vmatprep.mubr.bf16.mxu0 %v3662_v30  ;;  %2427 = vmatprep.mubr.bf16.mxu1 %v3662_v30 }
 0x100   : > { %2349 = vmatpush1.bf16.msra.mxu0 %v2319_v17  ;;  %2402 = vmatpush1.bf16.msra.mxu1 %v2325_v18 }
 0x101   : > { %2448 = vmatprep.subr.bf16.mxu0 %v3183_v19  ;;  %2501 = vmatprep.subr.bf16.mxu1 %v3185_v20 }
 0x103   : > { %3211 = vmatmul.mubr.msk.bf16.vlgmr.msra.gmra.mrb[8].mxu0 %vm2310_vm1, %v3648_v25  ;;  %3214 = vmatmul.mubr.msk.bf16.vlgmr.msra.gmra.mrb[8].mxu1 %vm2310_vm1, %v3648_v25 }
 0x104   : > { %2449 = vmatpush1.bf16.msra.mxu0 %v3182_v26  ;;  %2502 = vmatpush1.bf16.msra.mxu1 %v3184_v27 }
 0x105   : > { %2450 = vmatprep.subr.bf16.mxu0 %v3191_v28  ;;  %2503 = vmatprep.subr.bf16.mxu1 %v3193_v29 }
 0x106   : > { %2384 = vmatprep.mubr.bf16.mxu0 %v3662_v30  ;;  %2437 = vmatprep.mubr.bf16.mxu1 %v3662_v30 }
 0x108   : > { %2451 = vmatpush1.bf16.msra.mxu0 %v3190_v35  ;;  %2504 = vmatpush1.bf16.msra.mxu1 %v3192_v36 }
 0x109   : > { %2452 = vmatprep.subr.bf16.mxu0 %v3199_v37  ;;  %2505 = vmatprep.subr.bf16.mxu1 %v3201_v38 }
 0x10b   : > { %3212 = vmatmul.mubr.msk.bf16.gmra.mrb[12].mxu0 %vm2310_vm1, %v3649_v41  ;;  %3215 = vmatmul.mubr.msk.bf16.gmra.mrb[12].mxu1 %vm2310_vm1, %v3649_v41 }
 0x10c   : > { %2453 = vmatpush1.bf16.msra.mxu0 %v3198_v42  ;;  %2506 = vmatpush1.bf16.msra.mxu1 %v3200_v43 }
 0x10d   : > { %3216 = vmatprep.subr.msk.bf16.mxu0 %vm2317_vm0, %v3207_v44  ;;  %3219 = vmatprep.subr.msk.bf16.mxu1 %vm2317_vm0, %v3209_v45 }
 0x10e   : > { %2480 = vmatprep.mubr.bf16.mxu0 %v3662_v30  ;;  %2533 = vmatprep.mubr.bf16.mxu1 %v3662_v30 }
 0x110   : > { %2455 = vmatpush1.bf16.msra.mxu0 %v2331_v48  ;;  %2508 = vmatpush1.bf16.msra.mxu1 %v2337_v49 }
 0x113   : > { %3217 = vmatmul.mubr.msk.bf16.vlgmr.msra.gmra.mrb[16].mxu0 %vm2310_vm1, %v3648_v25  ;;  %3220 = vmatmul.mubr.msk.bf16.vlgmr.msra.gmra.mrb[16].mxu1 %vm2310_vm1, %v3648_v25 }
 0x114   : > { %2490 = vmatprep.mubr.bf16.mxu0 %v3662_v30  ;;  %2543 = vmatprep.mubr.bf16.mxu1 %v3662_v30 }
 0x11b   : > { %3218 = vmatmul.mubr.msk.bf16.gmra.mrb[20].mxu0 %vm2310_vm1, %v3649_v41  ;;  %3221 = vmatmul.mubr.msk.bf16.gmra.mrb[20].mxu1 %vm2310_vm1, %v3649_v41 }
 0x11c   : > { %2673 = vmatprep.mubr.bf16.mxu0 %v3662_v30  ;;  %2714 = vmatprep.mubr.bf16.mxu1 %v3662_v30 }
 0x1c6   : > { %v4106_v50 = vpop.f32.mrb[0].mxu0  ;;  %v4108_v51 = vpop.f32.mrb[0].mxu1 }
 0x1c7   : > { %v4110_v52 = vpop.f32.mrb[1].mxu0  ;;  %v4112_v53 = vpop.f32.mrb[1].mxu1 }
 0x1c8   : > { %v4114_v54 = vpop.f32.mrb[2].mxu0  ;;  %v4116_v55 = vpop.f32.mrb[2].mxu1 }
 0x1c9   : > { %v4118_v56 = vpop.f32.mrb[3].mxu0  ;;  %v4120_v57 = vpop.f32.mrb[3].mxu1 }
 0x1ce   : > { %v4122_v58 = vpop.f32.mrb[4].mxu0  ;;  %v4124_v59 = vpop.f32.mrb[4].mxu1 }
 0x1cf   : > { %v4126_v60 = vpop.f32.mrb[5].mxu0  ;;  %v4128_v61 = vpop.f32.mrb[5].mxu1 }
 0x1d0   : > { %v4130_v62 = vpop.f32.mrb[6].mxu0  ;;  %v4132_v63 = vpop.f32.mrb[6].mxu1 }
 0x1d1   : > { %v4134_v0 = vpop.f32.mrb[7].mxu0  ;;  %v4136_v1 = vpop.f32.mrb[7].mxu1 }
 0x1d6   : > { %v2376_v2 = vpop.f32.mrb[8].mxu0  ;;  %v2429_v3 = vpop.f32.mrb[8].mxu1 }
 0x1d7   : > { %v2554_v4 = vadd.f32 %v2376_v2, %v4106_v50  ;;  %v2556_v5 = vadd.f32 %v2429_v3, %v4108_v51  ;;  %v2378_v6 = vpop.f32.mrb[9].mxu0  ;;  %v2431_v7 = vpop.f32.mrb[9].mxu1 }
 0x1d8   : > { %v2555_v8 = vadd.f32 %v2378_v6, %v4110_v52  ;;  %v2557_v9 = vadd.f32 %v2431_v7, %v4112_v53  ;;  %v2380_v10 = vpop.f32.mrb[10].mxu0  ;;  %v2433_v11 = vpop.f32.mrb[10].mxu1 }
 0x1d9   : > { %v2562_v12 = vadd.f32 %v2380_v10, %v4114_v54  ;;  %v2564_v13 = vadd.f32 %v2433_v11, %v4116_v55  ;;  %v2382_v14 = vpop.f32.mrb[11].mxu0  ;;  %v2435_v15 = vpop.f32.mrb[11].mxu1  ;;  %v2586_v18 = vmax.f32 %v2554_v4, 0.0  ;;  %v2588_v19 = vmax.f32 %v2556_v5, 0.0 }
 0x1da   : > { %v2563_v16 = vadd.f32 %v2382_v14, %v4118_v56  ;;  %v2565_v17 = vadd.f32 %v2435_v15, %v4120_v57  ;;  %v2587_v22 = vmax.f32 %v2555_v8, 0.0  ;;  %v2589_v23 = vmax.f32 %v2557_v9, 0.0 }
 0x1db   : > { %v2594_v20 = vmax.f32 %v2562_v12, 0.0  ;;  %v2596_v21 = vmax.f32 %v2564_v13, 0.0 }
 0x1dc   : > { %v2595_v24 = vmax.f32 %v2563_v16, 0.0  ;;  %v2597_v25 = vmax.f32 %v2565_v17, 0.0 }
 0x1dd   : > { %v2619_v26 = vpack.c.bf16 %v2594_v20, %v2586_v18  ;;  %v2621_v27 = vpack.c.bf16 %v2596_v21, %v2588_v19 }
 0x1de   : > { %v2620_v28 = vpack.c.bf16 %v2595_v24, %v2587_v22  ;;  %v2622_v29 = vpack.c.bf16 %v2597_v25, %v2589_v23  ;;  %v2386_v31 = vpop.f32.mrb[12].mxu0  ;;  %v2439_v32 = vpop.f32.mrb[12].mxu1 }
 0x1df   : > { %v2570_v33 = vadd.f32 %v2386_v31, %v4122_v58  ;;  %v2572_v34 = vadd.f32 %v2439_v32, %v4124_v59  ;;  %v2388_v35 = vpop.f32.mrb[13].mxu0  ;;  %v2441_v36 = vpop.f32.mrb[13].mxu1 }
 0x1e0   : > { %v2571_v37 = vadd.f32 %v2388_v35, %v4126_v60  ;;  %v2573_v38 = vadd.f32 %v2441_v36, %v4128_v61  ;;  %v2390_v39 = vpop.f32.mrb[14].mxu0  ;;  %v2443_v40 = vpop.f32.mrb[14].mxu1  ;;  %2641 = vmatprep.subr.bf16.mxu0 %v2620_v28  ;;  %2682 = vmatprep.subr.bf16.mxu1 %v2622_v29 }
 0x1e1   : > { %v2578_v41 = vadd.f32 %v2390_v39, %v4130_v62  ;;  %v2580_v42 = vadd.f32 %v2443_v40, %v4132_v63  ;;  %v2392_v43 = vpop.f32.mrb[15].mxu0  ;;  %v2445_v44 = vpop.f32.mrb[15].mxu1  ;;  %2642 = vmatpush1.bf16.msra.mxu0 %v2619_v26  ;;  %2683 = vmatpush1.bf16.msra.mxu1 %v2621_v27  ;;  %v2602_v47 = vmax.f32 %v2570_v33, 0.0  ;;  %v2604_v48 = vmax.f32 %v2572_v34, 0.0 }
 0x1e2   : > { %v2579_v45 = vadd.f32 %v2392_v43, %v4134_v0  ;;  %v2581_v46 = vadd.f32 %v2445_v44, %v4136_v1  ;;  %v2603_v3 = vmax.f32 %v2571_v37, 0.0  ;;  %v2605_v4 = vmax.f32 %v2573_v38, 0.0 }
 0x1e3   : > { %v2610_v49 = vmax.f32 %v2578_v41, 0.0  ;;  %v2612_v2 = vmax.f32 %v2580_v42, 0.0 }
 0x1e4   : > { %v2611_v5 = vmax.f32 %v2579_v45, 0.0  ;;  %v2613_v6 = vmax.f32 %v2581_v46, 0.0 }
 0x1e5   : > { %v2627_v7 = vpack.c.bf16 %v2610_v49, %v2602_v47  ;;  %v2629_v8 = vpack.c.bf16 %v2612_v2, %v2604_v48 }
 0x1e6   : > { %v2628_v9 = vpack.c.bf16 %v2611_v5, %v2603_v3  ;;  %v2630_v10 = vpack.c.bf16 %v2613_v6, %v2605_v4  ;;  %v2482_v11 = vpop.f32.mrb[16].mxu0  ;;  %v2535_v12 = vpop.f32.mrb[16].mxu1  ;;  %v2820_v6 = vlaneseq }
 0x1e7   : > { %v2558_v13 = vadd.f32 %v2482_v11, %v4106_v50  ;;  %v2560_v14 = vadd.f32 %v2535_v12, %v4108_v51  ;;  %v2484_v15 = vpop.f32.mrb[17].mxu0  ;;  %v2537_v16 = vpop.f32.mrb[17].mxu1  ;;  %v2618_v50 = vld [vmem:[%s4190_s4] sm:$0x1] }
 0x1e8   : > { %v2559_v17 = vadd.f32 %v2484_v15, %v4110_v52  ;;  %v2561_v18 = vadd.f32 %v2537_v16, %v4112_v53  ;;  %v2486_v19 = vpop.f32.mrb[18].mxu0  ;;  %v2539_v20 = vpop.f32.mrb[18].mxu1  ;;  %2643 = vmatprep.subr.bf16.mxu0 %v2628_v9  ;;  %2684 = vmatprep.subr.bf16.mxu1 %v2630_v10  ;;  %v2821_v9 = vshrl.u32 %v2820_v6, 7 }
 0x1e9   : > { %v2566_v21 = vadd.f32 %v2486_v19, %v4114_v54  ;;  %v2568_v22 = vadd.f32 %v2539_v20, %v4116_v55  ;;  %v2488_v23 = vpop.f32.mrb[19].mxu0  ;;  %v2541_v24 = vpop.f32.mrb[19].mxu1  ;;  %2644 = vmatpush1.bf16.msra.mxu0 %v2627_v7  ;;  %2685 = vmatpush1.bf16.msra.mxu1 %v2629_v8  ;;  %v2590_v53 = vmax.f32 %v2558_v13, 0.0  ;;  %v2592_v25 = vmax.f32 %v2560_v14, 0.0 }
 0x1ea   : > { %v2567_v51 = vadd.f32 %v2488_v23, %v4118_v56  ;;  %v2569_v52 = vadd.f32 %v2541_v24, %v4120_v57  ;;  %v2591_v54 = vmax.f32 %v2559_v17, 0.0  ;;  %v2593_v28 = vmax.f32 %v2561_v18, 0.0 }
 0x1eb   : > { %v2598_v26 = vmax.f32 %v2566_v21, 0.0  ;;  %v2600_v27 = vmax.f32 %v2568_v22, 0.0  ;;  %v2636_v7 = vstv %s2635_s28 }
 0x1ec   : > { %v2599_v55 = vmax.f32 %v2567_v51, 0.0  ;;  %v2601_v29 = vmax.f32 %v2569_v52, 0.0  ;;  %3222 = vmatmul.mubr.msk.bf16.vlgmr.msra.gmra.mrb[24].mxu0 %vm2637_vm2, %v2618_v50  ;;  %3223 = vmatmul.mubr.msk.bf16.vlgmr.msra.gmra.mrb[24].mxu1 %vm2637_vm2, %v2618_v50 }
 0x1ed   : > { %v2623_v31 = vpack.c.bf16 %v2598_v26, %v2590_v53  ;;  %v2625_v32 = vpack.c.bf16 %v2600_v27, %v2592_v25  ;;  %2755 = vmatprep.mubr.bf16.mxu0 %v3662_v30  ;;  %2796 = vmatprep.mubr.bf16.mxu1 %v3662_v30 }
 0x1ee   : > { %v2624_v56 = vpack.c.bf16 %v2599_v55, %v2591_v54  ;;  %v2626_v57 = vpack.c.bf16 %v2601_v29, %v2593_v28  ;;  %v2492_v33 = vpop.f32.mrb[20].mxu0  ;;  %v2545_v34 = vpop.f32.mrb[20].mxu1 }
 0x1ef   : > { %v2574_v35 = vadd.f32 %v2492_v33, %v4122_v58  ;;  %v2576_v36 = vadd.f32 %v2545_v34, %v4124_v59  ;;  %v2494_v37 = vpop.f32.mrb[21].mxu0  ;;  %v2547_v38 = vpop.f32.mrb[21].mxu1 }
 0x1f0   : > { %v2575_v39 = vadd.f32 %v2494_v37, %v4126_v60  ;;  %v2577_v40 = vadd.f32 %v2547_v38, %v4128_v61  ;;  %v2496_v41 = vpop.f32.mrb[22].mxu0  ;;  %v2549_v42 = vpop.f32.mrb[22].mxu1  ;;  %2723 = vmatprep.subr.bf16.mxu0 %v2624_v56  ;;  %2764 = vmatprep.subr.bf16.mxu1 %v2626_v57 }
 0x1f1   : > { %v2582_v30 = vadd.f32 %v2496_v41, %v4130_v62  ;;  %v2584_v43 = vadd.f32 %v2549_v42, %v4132_v63  ;;  %v2498_v44 = vpop.f32.mrb[23].mxu0  ;;  %v2551_v45 = vpop.f32.mrb[23].mxu1  ;;  %2724 = vmatpush1.bf16.msra.mxu0 %v2623_v31  ;;  %2765 = vmatpush1.bf16.msra.mxu1 %v2625_v32  ;;  %v2606_v46 = vmax.f32 %v2574_v35, 0.0  ;;  %v2608_v60 = vmax.f32 %v2576_v36, 0.0 }
 0x1f2   : > { %v2583_v58 = vadd.f32 %v2498_v44, %v4134_v0  ;;  %v2585_v59 = vadd.f32 %v2551_v45, %v4136_v1  ;;  %v2607_v48 = vmax.f32 %v2575_v39, 0.0  ;;  %v2609_v49 = vmax.f32 %v2577_v40, 0.0 }
 0x1f3   : > { %v2614_v47 = vmax.f32 %v2582_v30, 0.0  ;;  %v2616_v61 = vmax.f32 %v2584_v43, 0.0  ;;  %v3663_v0 = vmov 1966171168  }
 0x1f4   : > { %v2615_v2 = vmax.f32 %v2583_v58, 0.0  ;;  %v2617_v3 = vmax.f32 %v2585_v59, 0.0  ;;  %v2818_v1 = vunpack.c.l.s4 %v3663_v0 }
 0x1f5   : > { %v2631_v4 = vpack.c.bf16 %v2614_v47, %v2606_v46  ;;  %v2633_v62 = vpack.c.bf16 %v2616_v61, %v2608_v60 }
 0x1f6   : > { %v2632_v5 = vpack.c.bf16 %v2615_v2, %v2607_v48  ;;  %v2634_v63 = vpack.c.bf16 %v2617_v3, %v2609_v49  ;;  %v2819_v8 = vunpack.c.0.s8 %v2818_v1 }
 0x1f8   : > { %2725 = vmatprep.subr.bf16.mxu0 %v2632_v5  ;;  %2766 = vmatprep.subr.bf16.mxu1 %v2634_v63  ;;  %v2822_v17 = vsub.s32 %v2819_v8, %v2821_v9 }
 0x1f9   : > { %2726 = vmatpush1.bf16.msra.mxu0 %v2631_v4  ;;  %2767 = vmatpush1.bf16.msra.mxu1 %v2633_v62 }
 0x1fc   : > { %3224 = vmatmul.mubr.msk.bf16.vlgmr.msra.gmra.mrb[28].mxu0 %vm2637_vm2, %v2618_v50  ;;  %3225 = vmatmul.mubr.msk.bf16.vlgmr.msra.gmra.mrb[28].mxu1 %vm2637_vm2, %v2618_v50 }
 0x2bf   : > { %v2675_v10 = vpop.f32.mrb[24].mxu0  ;;  %v2716_v11 = vpop.f32.mrb[24].mxu1 }
 0x2c0   : > { %v2676_v12 = vadd.f32 %v2675_v10, %v2636_v7  ;;  %v2717_v13 = vadd.f32 %v2716_v11, %v2636_v7  ;;  %v2677_v14 = vpop.f32.mrb[25].mxu0  ;;  %v2718_v15 = vpop.f32.mrb[25].mxu1 }
 0x2c1   : > { %v2678_v16 = vadd.f32 %v2677_v14, %v2636_v7  ;;  %v2719_v18 = vadd.f32 %v2718_v15, %v2636_v7  ;;  %v2679_v19 = vpop.f32.mrb[26].mxu0  ;;  %v2720_v20 = vpop.f32.mrb[26].mxu1 }
 0x2c2   : > { %v2680_v21 = vpop.f32.mrb[27].mxu0  ;;  %v2721_v22 = vpop.f32.mrb[27].mxu1 }
 0x2c3   : > { %v2813_v23 = vcombine.low %v2676_v12, %v2678_v16  ;;  %v2814_v24 = vcombine.low %v2717_v13, %v2719_v18 }
 0x2c5   : > { %v2823_v50 = vrot.slane %v2813_v23, %v2822_v17  ;;  %v2830_v51 = vrot.slane %v2814_v24, %v2822_v17 }
 0x2c7   : > { %v2845_v52 = vcombine.low %v2823_v50, %v2830_v51 }
 0x2c9   : > { %v2853_v38 = vrot.slane %v2845_v52, %v2822_v17 }
 0x2cf   : > { %v2757_v53 = vpop.f32.mrb[28].mxu0  ;;  %v2798_v25 = vpop.f32.mrb[28].mxu1 }
 0x2d0   : > { %v2758_v26 = vadd.f32 %v2757_v53, %v2636_v7  ;;  %v2799_v27 = vadd.f32 %v2798_v25, %v2636_v7  ;;  %v2759_v54 = vpop.f32.mrb[29].mxu0  ;;  %v2800_v28 = vpop.f32.mrb[29].mxu1 }
 0x2d1   : > { %v2760_v55 = vadd.f32 %v2759_v54, %v2636_v7  ;;  %v2801_v29 = vadd.f32 %v2800_v28, %v2636_v7  ;;  %v2761_v31 = vpop.f32.mrb[30].mxu0  ;;  %v2802_v32 = vpop.f32.mrb[30].mxu1 }
 0x2d2   : > { %v2762_v56 = vpop.f32.mrb[31].mxu0  ;;  %v2803_v57 = vpop.f32.mrb[31].mxu1 }
 0x2d3   : > { %v2815_v33 = vcombine.low %v2758_v26, %v2760_v55  ;;  %v2816_v34 = vcombine.low %v2799_v27, %v2801_v29 }
 0x2d5   : > { %v2837_v35 = vrot.slane %v2815_v33, %v2822_v17  ;;  %v2844_v36 = vrot.slane %v2816_v34, %v2822_v17 }
 0x2d7   : > { %v2846_v37 = vcombine.low %v2837_v35, %v2844_v36 }
 0x2d9   : > { %v2860_v39 = vrot.slane %v2846_v37, %v2822_v17 }
 0x2db   : > { %v2861_v40 = vcombine.low %v2853_v38, %v2860_v39 }
 0x2dd   : > { %2863 = vst [vmem:[%s270_s9] sm:$0xff] %v2861_v40 }
 0x2de PF: > { %s17_s23 = sadd.s32 1, %s3660_s23  }
 0x2df   : > { %p14_p4 = scmp.ge.s32.totalorder %s17_s23, 4  }
 0x2e1   :  { %16 = sbr.rel (!%p14_p4) target bundleno = 2 (0x2), region = 77 }

</bundles_post_ra>
